<compile_context>
chip_gen: v6e
topology: v6e:2x2x1
jax: 0.10.0
libtpu: 0.0.40
codegen_flags: <defaults>
</compile_context>

<pallas_src>
import jax
import jax.numpy as jnp
from jax.experimental import pallas as pl
from jax.experimental.pallas import tpu as pltpu


C1, C2, C3 = 64, 128, 1024          # conv channel widths
F1, F2, F3 = 512, 256, 9            # fc widths
OUT_PAD = 128                       # lane-dense padded width for the fc3 output


def _round_up(x, m):
    return ((x + m - 1) // m) * m


def _choose_tiles(B, N):
    """Pick (Bt, Bp, Tn, Np) so that M = Bt*Tn ~ 1024 rows and all block dims
    satisfy the (8, 128)/full-dim constraint while keeping the conv3
    intermediate (M, 1024) f32 around 4-8 MB of VMEM."""
    Np = _round_up(N, 8)
    if Np <= 256:
        Tn = Np                                   # single point tile
    else:
        Tn = 256
        Np = _round_up(N, Tn)

    target_m = 1024
    bt_raw = max(1, target_m // Tn)
    if bt_raw >= B:
        Bt, Bp = B, B                             # one batch tile == full B
    else:
        Bt = max(8, (bt_raw // 8) * 8)            # 8-aligned (output block dim)
        Bp = _round_up(B, Bt)
    return Bt, Bp, Tn, Np


# ---------------------------------------------------------------------------
# Kernel 1: conv1/conv2/conv3 (+ReLU) and global max-pool over the point axis.
# Grid = (batch tiles, point tiles); point axis is the trailing reduction axis.
# ---------------------------------------------------------------------------
def conv_pool_kernel(x_ref, w1_ref, b1_ref, w2_ref, b2_ref, w3_ref, b3_ref,
                     g_ref):
    bt, tn, _ = x_ref.shape
    x = x_ref[...].reshape(bt * tn, 3)                       # (M, 3) f32

    # conv1: 3 -> 64.  A K=3 MXU contraction wastes >97% of the push; do it on
    # the VPU as three broadcast FMAs instead (co-issues with MXU work).
    h = (x[:, 0:1] * w1_ref[0:1, :]
         + x[:, 1:2] * w1_ref[1:2, :]
         + x[:, 2:3] * w1_ref[2:3, :]
         + b1_ref[...])
    h = jnp.maximum(h, 0.0)                                  # (M, 64) f32

    # conv2: 64 -> 128 (bf16 MXU inputs, f32 accumulation).
    h = jnp.dot(h.astype(jnp.bfloat16), w2_ref[...],
                preferred_element_type=jnp.float32) + b2_ref[...]
    h = jnp.maximum(h, 0.0)                                  # (M, 128)

    # conv3: 128 -> 1024.
    h = jnp.dot(h.astype(jnp.bfloat16), w3_ref[...],
                preferred_element_type=jnp.float32) + b3_ref[...]
    h = jnp.maximum(h, 0.0)                                  # (M, 1024)

    # Per-batch-element max over this tile of points (sublane-segment reduce).
    tile_max = jnp.max(h.reshape(bt, tn, C3), axis=1)        # (Bt, 1024)

    # Running max across point tiles: the output block is resident across the
    # trailing "arbitrary" grid axis, so it doubles as the accumulator.
    @pl.when(pl.program_id(1) == 0)
    def _():
        g_ref[...] = tile_max

    @pl.when(pl.program_id(1) > 0)
    def _():
        g_ref[...] = jnp.maximum(g_ref[...], tile_max)


# ---------------------------------------------------------------------------
# Kernel 2: batched FC head, (B, 1024) -> (B, OUT_PAD) in one shot.
# ---------------------------------------------------------------------------
def fc_head_kernel(g_ref, fw1_ref, fb1_ref, fw2_ref, fb2_ref, fw3_ref,
                   fb3_ref, out_ref):
    g = g_ref[...].astype(jnp.bfloat16)                      # (B, 1024)

    f = jnp.dot(g, fw1_ref[...], preferred_element_type=jnp.float32)
    f = jnp.maximum(f + fb1_ref[...], 0.0)                   # (B, 512)

    f = jnp.dot(f.astype(jnp.bfloat16), fw2_ref[...],
                preferred_element_type=jnp.float32)
    f = jnp.maximum(f + fb2_ref[...], 0.0)                   # (B, 256)

    # fc3 (identity bias already folded into fb3; out dim padded 9 -> 128).
    out_ref[...] = jnp.dot(f.astype(jnp.bfloat16), fw3_ref[...],
                           preferred_element_type=jnp.float32) + fb3_ref[...]


# ---------------------------------------------------------------------------
# Wrapper
# ---------------------------------------------------------------------------
def stn3d_forward(x_ncl, params):
    """x_ncl: (B, 3, N) float32 (PyTorch NCL layout). Returns (B, 3, 3)."""
    x = x_ncl.astype(jnp.float32)
    B, c_in, N = x.shape
    assert c_in == 3
    (w1, b1, w2, b2, w3, b3, fw1, fb1, fw2, fb2, fw3, fb3) = params

    Bt, Bp, Tn, Np = _choose_tiles(B, N)

    # channels-last (B, N, 3), padded.  Point padding replicates the last
    # point ('edge') so the max-pool result is unchanged; batch padding rows
    # are discarded at the end.
    x_nlc = jnp.transpose(x, (0, 2, 1))                      # (B, N, 3)
    if Np > N:
        x_nlc = jnp.pad(x_nlc, ((0, 0), (0, Np - N), (0, 0)), mode="edge")
    if Bp > B:
        x_nlc = jnp.pad(x_nlc, ((0, Bp - B), (0, 0), (0, 0)))

    # Weights feeding the MXU are cast to bf16 (f32 accumulation in-kernel);
    # conv1 weights / all biases stay f32 (VPU path).
    w2b = w2.astype(jnp.bfloat16)
    w3b = w3.astype(jnp.bfloat16)
    fw1b = fw1.astype(jnp.bfloat16)
    fw2b = fw2.astype(jnp.bfloat16)

    # Fold the identity bias into fc3's bias and pad fc3 to a lane-dense width.
    iden = jnp.array([1, 0, 0, 0, 1, 0, 0, 0, 1], dtype=jnp.float32)[None, :]
    fw3_pad = jnp.pad(fw3, ((0, 0), (0, OUT_PAD - F3))).astype(jnp.bfloat16)
    fb3_pad = jnp.pad(fb3 + iden, ((0, 0), (0, OUT_PAD - F3)))   # (1, 128) f32

    # --- kernel 1: conv chain + global max pool -> (Bp, 1024) ---------------
    cost1 = pl.CostEstimate(
        flops=2 * Bp * Np * (3 * C1 + C1 * C2 + C2 * C3),
        transcendentals=0,
        bytes_accessed=(x_nlc.size * 4
                        + w1.size * 4 + b1.size * 4
                        + w2b.size * 2 + b2.size * 4
                        + w3b.size * 2 + b3.size * 4
                        + Bp * C3 * 4),
    )
    gfeat = pl.pallas_call(
        conv_pool_kernel,
        out_shape=jax.ShapeDtypeStruct((Bp, C3), jnp.float32),
        grid_spec=pltpu.PrefetchScalarGridSpec(
            num_scalar_prefetch=0,
            grid=(Bp // Bt, Np // Tn),
            in_specs=[
                pl.BlockSpec((Bt, Tn, 3), lambda b, n: (b, n, 0)),   # x
                pl.BlockSpec((3, C1),     lambda b, n: (0, 0)),      # w1
                pl.BlockSpec((1, C1),     lambda b, n: (0, 0)),      # b1
                pl.BlockSpec((C1, C2),    lambda b, n: (0, 0)),      # w2
                pl.BlockSpec((1, C2),     lambda b, n: (0, 0)),      # b2
                pl.BlockSpec((C2, C3),    lambda b, n: (0, 0)),      # w3
                pl.BlockSpec((1, C3),     lambda b, n: (0, 0)),      # b3
            ],
            out_specs=pl.BlockSpec((Bt, C3), lambda b, n: (b, 0)),
        ),
        compiler_params=pltpu.CompilerParams(
            dimension_semantics=("parallel", "arbitrary"),
            vmem_limit_bytes=32 * 1024 * 1024,
        ),
        cost_estimate=cost1,
    )(x_nlc, w1, b1, w2b, b2, w3b, b3)

    # --- kernel 2: batched FC head -> (Bp, 128), lane-dense output ----------
    cost2 = pl.CostEstimate(
        flops=2 * Bp * (C3 * F1 + F1 * F2 + F2 * OUT_PAD),
        transcendentals=0,
        bytes_accessed=(Bp * C3 * 4
                        + fw1b.size * 2 + fb1.size * 4
                        + fw2b.size * 2 + fb2.size * 4
                        + fw3_pad.size * 2 + fb3_pad.size * 4
                        + Bp * OUT_PAD * 4),
    )
    out_pad = pl.pallas_call(
        fc_head_kernel,
        out_shape=jax.ShapeDtypeStruct((Bp, OUT_PAD), jnp.float32),
        grid_spec=pltpu.PrefetchScalarGridSpec(
            num_scalar_prefetch=0,
            grid=(1,),
            in_specs=[
                pl.BlockSpec((Bp, C3),       lambda i: (0, 0)),      # gfeat
                pl.BlockSpec((C3, F1),       lambda i: (0, 0)),      # fw1
                pl.BlockSpec((1, F1),        lambda i: (0, 0)),      # fb1
                pl.BlockSpec((F1, F2),       lambda i: (0, 0)),      # fw2
                pl.BlockSpec((1, F2),        lambda i: (0, 0)),      # fb2
                pl.BlockSpec((F2, OUT_PAD),  lambda i: (0, 0)),      # fw3 (padded)
                pl.BlockSpec((1, OUT_PAD),   lambda i: (0, 0)),      # fb3 + iden
            ],
            out_specs=pl.BlockSpec((Bp, OUT_PAD), lambda i: (0, 0)),
        ),
        compiler_params=pltpu.CompilerParams(
            dimension_semantics=("arbitrary",),
            vmem_limit_bytes=32 * 1024 * 1024,
        ),
        cost_estimate=cost2,
    )(gfeat, fw1b, fb1, fw2b, fb2, fw3_pad, fb3_pad)

    # slice off batch/lane padding and reshape to the 3x3 transforms
    return out_pad[:B, :F3].reshape(B, 3, 3)


def init_params(key):
    """Deterministic synthetic init. Weight layout is (in, out) for matmul;
    PyTorch stores Conv1d weights as (out, in, 1) and Linear as (out, in)."""
    ks = jax.random.split(key, 12)

    def w(k, cin, cout):
        bound = 1.0 / jnp.sqrt(cin)
        return jax.random.uniform(k, (cin, cout), jnp.float32, -bound, bound)

    def b(k, cin, cout):
        bound = 1.0 / jnp.sqrt(cin)
        return jax.random.uniform(k, (1, cout), jnp.float32, -bound, bound)

    return (
        w(ks[0], 3, C1),    b(ks[1], 3, C1),      # conv1
        w(ks[2], C1, C2),   b(ks[3], C1, C2),     # conv2
        w(ks[4], C2, C3),   b(ks[5], C2, C3),     # conv3
        w(ks[6], C3, F1),   b(ks[7], C3, F1),     # fc1
        w(ks[8], F1, F2),   b(ks[9], F1, F2),     # fc2
        w(ks[10], F2, F3),  b(ks[11], F2, F3),    # fc3
    )


if __name__ == "__main__":
    key = jax.random.PRNGKey(0)
    k_x, k_p = jax.random.split(key)

    B, N = 2, 16
    x = jax.random.normal(k_x, (B, 3, N), dtype=jnp.float32)   # PyTorch NCL input
    params = init_params(k_p)

    out = jax.jit(stn3d_forward)(x, params)
    out = jax.block_until_ready(out)
    assert out.shape == (B, 3, 3) and out.dtype == jnp.float32
    print("KERNEL_OK")
</pallas_src>

<mosaic_0001>
module attributes {stable_mosaic.version = 11 : i64} {
  func.func @conv_pool_kernel(%arg0: i32, %arg1: i32, %arg2: memref<2x16x3xf32, #tpu.memory_space<vmem>>, %arg3: memref<3x64xf32, #tpu.memory_space<vmem>>, %arg4: memref<1x64xf32, #tpu.memory_space<vmem>>, %arg5: memref<64x128xbf16, #tpu.memory_space<vmem>>, %arg6: memref<1x128xf32, #tpu.memory_space<vmem>>, %arg7: memref<128x1024xbf16, #tpu.memory_space<vmem>>, %arg8: memref<1x1024xf32, #tpu.memory_space<vmem>>, %arg9: memref<2x1024xf32, #tpu.memory_space<vmem>>) attributes {dimension_semantics = [#tpu.dimension_semantics<parallel>, #tpu.dimension_semantics<arbitrary>], iteration_bounds = array<i64: 1, 1>, scalar_prefetch = 0 : i64, scratch_operands = 0 : i64, tpu.core_type = #tpu.core_type<tc>, window_params = [{transform_indices = @transform_0, window_bounds = array<i64: 2, 16, 3>}, {pipeline_mode = #tpu.pipeline_mode<synchronous>, transform_indices = @transform_1, window_bounds = array<i64: 3, 64>}, {pipeline_mode = #tpu.pipeline_mode<synchronous>, transform_indices = @transform_2, window_bounds = array<i64: 1, 64>}, {pipeline_mode = #tpu.pipeline_mode<synchronous>, transform_indices = @transform_3, window_bounds = array<i64: 64, 128>}, {pipeline_mode = #tpu.pipeline_mode<synchronous>, transform_indices = @transform_4, window_bounds = array<i64: 1, 128>}, {pipeline_mode = #tpu.pipeline_mode<synchronous>, transform_indices = @transform_5, window_bounds = array<i64: 128, 1024>}, {pipeline_mode = #tpu.pipeline_mode<synchronous>, transform_indices = @transform_6, window_bounds = array<i64: 1, 1024>}, {transform_indices = @transform_7, window_bounds = array<i64: 2, 1024>}]} {
    %c0 = arith.constant 0 : index
    %c0_0 = arith.constant 0 : index
    %c0_1 = arith.constant 0 : index
    %0 = vector.load %arg2[%c0, %c0_0, %c0_1] : memref<2x16x3xf32, #tpu.memory_space<vmem>>, vector<2x16x3xf32>
    %1 = vector.shape_cast %0 : vector<2x16x3xf32> to vector<32x3xf32>
    %2 = vector.extract_strided_slice %1 {offsets = [0, 0], sizes = [32, 1], strides = [1, 1]} : vector<32x3xf32> to vector<32x1xf32>
    %c0_2 = arith.constant 0 : index
    %c0_3 = arith.constant 0 : index
    %3 = vector.load %arg3[%c0_2, %c0_3] : memref<3x64xf32, #tpu.memory_space<vmem>>, vector<1x64xf32>
    %4 = vector.broadcast %2 : vector<32x1xf32> to vector<32x64xf32>
    %5 = vector.broadcast %3 : vector<1x64xf32> to vector<32x64xf32>
    %6 = arith.mulf %4, %5 : vector<32x64xf32>
    %7 = vector.extract_strided_slice %1 {offsets = [0, 1], sizes = [32, 1], strides = [1, 1]} : vector<32x3xf32> to vector<32x1xf32>
    %c1 = arith.constant 1 : index
    %c0_4 = arith.constant 0 : index
    %8 = vector.load %arg3[%c1, %c0_4] : memref<3x64xf32, #tpu.memory_space<vmem>>, vector<1x64xf32>
    %9 = vector.broadcast %7 : vector<32x1xf32> to vector<32x64xf32>
    %10 = vector.broadcast %8 : vector<1x64xf32> to vector<32x64xf32>
    %11 = arith.mulf %9, %10 : vector<32x64xf32>
    %12 = arith.addf %6, %11 : vector<32x64xf32>
    %13 = vector.extract_strided_slice %1 {offsets = [0, 2], sizes = [32, 1], strides = [1, 1]} : vector<32x3xf32> to vector<32x1xf32>
    %c2 = arith.constant 2 : index
    %c0_5 = arith.constant 0 : index
    %14 = vector.load %arg3[%c2, %c0_5] : memref<3x64xf32, #tpu.memory_space<vmem>>, vector<1x64xf32>
    %15 = vector.broadcast %13 : vector<32x1xf32> to vector<32x64xf32>
    %16 = vector.broadcast %14 : vector<1x64xf32> to vector<32x64xf32>
    %17 = arith.mulf %15, %16 : vector<32x64xf32>
    %18 = arith.addf %12, %17 : vector<32x64xf32>
    %c0_6 = arith.constant 0 : index
    %c0_7 = arith.constant 0 : index
    %19 = vector.load %arg4[%c0_6, %c0_7] : memref<1x64xf32, #tpu.memory_space<vmem>>, vector<1x64xf32>
    %20 = vector.broadcast %19 : vector<1x64xf32> to vector<32x64xf32>
    %21 = arith.addf %18, %20 : vector<32x64xf32>
    %cst = arith.constant 0.000000e+00 : f32
    %22 = vector.broadcast %cst : f32 to vector<32x64xf32>
    %23 = arith.maximumf %21, %22 : vector<32x64xf32>
    %24 = arith.truncf %23 : vector<32x64xf32> to vector<32x64xbf16>
    %c0_8 = arith.constant 0 : index
    %c0_9 = arith.constant 0 : index
    %25 = vector.load %arg5[%c0_8, %c0_9] : memref<64x128xbf16, #tpu.memory_space<vmem>>, vector<64x128xbf16>
    %cst_10 = arith.constant dense<0.000000e+00> : vector<32x128xf32>
    %26 = tpu.matmul %24, %25, %cst_10 {dimension_numbers = #tpu.dot_dimension_numbers<[1], [0], [0], [1], [0, 0, 1, 1], [], []>} : vector<32x64xbf16>, vector<64x128xbf16>, vector<32x128xf32> -> vector<32x128xf32>
    %c0_11 = arith.constant 0 : index
    %c0_12 = arith.constant 0 : index
    %27 = vector.load %arg6[%c0_11, %c0_12] : memref<1x128xf32, #tpu.memory_space<vmem>>, vector<1x128xf32>
    %28 = vector.broadcast %27 : vector<1x128xf32> to vector<32x128xf32>
    %29 = arith.addf %26, %28 : vector<32x128xf32>
    %cst_13 = arith.constant 0.000000e+00 : f32
    %30 = vector.broadcast %cst_13 : f32 to vector<32x128xf32>
    %31 = arith.maximumf %29, %30 : vector<32x128xf32>
    %32 = arith.truncf %31 : vector<32x128xf32> to vector<32x128xbf16>
    %c0_14 = arith.constant 0 : index
    %c0_15 = arith.constant 0 : index
    %33 = vector.load %arg7[%c0_14, %c0_15] : memref<128x1024xbf16, #tpu.memory_space<vmem>>, vector<128x1024xbf16>
    %cst_16 = arith.constant dense<0.000000e+00> : vector<32x1024xf32>
    %34 = tpu.matmul %32, %33, %cst_16 {dimension_numbers = #tpu.dot_dimension_numbers<[1], [0], [0], [1], [0, 0, 1, 1], [], []>} : vector<32x128xbf16>, vector<128x1024xbf16>, vector<32x1024xf32> -> vector<32x1024xf32>
    %c0_17 = arith.constant 0 : index
    %c0_18 = arith.constant 0 : index
    %35 = vector.load %arg8[%c0_17, %c0_18] : memref<1x1024xf32, #tpu.memory_space<vmem>>, vector<1x1024xf32>
    %36 = vector.broadcast %35 : vector<1x1024xf32> to vector<32x1024xf32>
    %37 = arith.addf %34, %36 : vector<32x1024xf32>
    %cst_19 = arith.constant 0.000000e+00 : f32
    %38 = vector.broadcast %cst_19 : f32 to vector<32x1024xf32>
    %39 = arith.maximumf %37, %38 : vector<32x1024xf32>
    %40 = vector.shape_cast %39 : vector<32x1024xf32> to vector<2x16x1024xf32>
    %cst_20 = arith.constant dense<0xFF800000> : vector<2x1024xf32>
    %41 = vector.multi_reduction <maximumf>, %40, %cst_20 [1] : vector<2x16x1024xf32> to vector<2x1024xf32>
    %c0_i32 = arith.constant 0 : i32
    %42 = arith.cmpi eq, %arg1, %c0_i32 : i32
    %43 = arith.extui %42 : i1 to i32
    %c0_i32_21 = arith.constant 0 : i32
    %44 = arith.cmpi ne, %43, %c0_i32_21 : i32
    scf.if %44 {
      %c0_24 = arith.constant 0 : index
      %c0_25 = arith.constant 0 : index
      %48 = vector.load %arg9[%c0_24, %c0_25] : memref<2x1024xf32, #tpu.memory_space<vmem>>, vector<2x1024xf32>
      tpu.vector_store %arg9[%c0_24, %c0_25], %41 {strides = array<i32>} : memref<2x1024xf32, #tpu.memory_space<vmem>>, vector<2x1024xf32>,
    } else {
    }
    %c0_i32_22 = arith.constant 0 : i32
    %45 = arith.cmpi sgt, %arg1, %c0_i32_22 : i32
    %46 = arith.extui %45 : i1 to i32
    %c0_i32_23 = arith.constant 0 : i32
    %47 = arith.cmpi ne, %46, %c0_i32_23 : i32
    scf.if %47 {
      %c0_24 = arith.constant 0 : index
      %c0_25 = arith.constant 0 : index
      %48 = vector.load %arg9[%c0_24, %c0_25] : memref<2x1024xf32, #tpu.memory_space<vmem>>, vector<2x1024xf32>
      %49 = arith.maximumf %48, %41 : vector<2x1024xf32>
      %c0_26 = arith.constant 0 : index
      %c0_27 = arith.constant 0 : index
      %50 = vector.load %arg9[%c0_26, %c0_27] : memref<2x1024xf32, #tpu.memory_space<vmem>>, vector<2x1024xf32>
      tpu.vector_store %arg9[%c0_26, %c0_27], %49 {strides = array<i32>} : memref<2x1024xf32, #tpu.memory_space<vmem>>, vector<2x1024xf32>,
    } else {
    }
    return
  }
  func.func @transform_0(%arg0: i32, %arg1: i32) -> (i32, i32, i32) {
    %c0_i32 = arith.constant 0 : i32
    %c0_i32_0 = arith.constant 0 : i32
    return %arg0, %arg1, %c0_i32 : i32, i32, i32
  }
  func.func @transform_1(%arg0: i32, %arg1: i32) -> (i32, i32) {
    %c0_i32 = arith.constant 0 : i32
    %c0_i32_0 = arith.constant 0 : i32
    %c0_i32_1 = arith.constant 0 : i32
    return %c0_i32, %c0_i32_0 : i32, i32
  }
  func.func @transform_2(%arg0: i32, %arg1: i32) -> (i32, i32) {
    %c0_i32 = arith.constant 0 : i32
    %c0_i32_0 = arith.constant 0 : i32
    %c0_i32_1 = arith.constant 0 : i32
    return %c0_i32, %c0_i32_0 : i32, i32
  }
  func.func @transform_3(%arg0: i32, %arg1: i32) -> (i32, i32) {
    %c0_i32 = arith.constant 0 : i32
    %c0_i32_0 = arith.constant 0 : i32
    %c0_i32_1 = arith.constant 0 : i32
    return %c0_i32, %c0_i32_0 : i32, i32
  }
  func.func @transform_4(%arg0: i32, %arg1: i32) -> (i32, i32) {
    %c0_i32 = arith.constant 0 : i32
    %c0_i32_0 = arith.constant 0 : i32
    %c0_i32_1 = arith.constant 0 : i32
    return %c0_i32, %c0_i32_0 : i32, i32
  }
  func.func @transform_5(%arg0: i32, %arg1: i32) -> (i32, i32) {
    %c0_i32 = arith.constant 0 : i32
    %c0_i32_0 = arith.constant 0 : i32
    %c0_i32_1 = arith.constant 0 : i32
    return %c0_i32, %c0_i32_0 : i32, i32
  }
  func.func @transform_6(%arg0: i32, %arg1: i32) -> (i32, i32) {
    %c0_i32 = arith.constant 0 : i32
    %c0_i32_0 = arith.constant 0 : i32
    %c0_i32_1 = arith.constant 0 : i32
    return %c0_i32, %c0_i32_0 : i32, i32
  }
  func.func @transform_7(%arg0: i32, %arg1: i32) -> (i32, i32) {
    %c0_i32 = arith.constant 0 : i32
    %c0_i32_0 = arith.constant 0 : i32
    return %arg0, %c0_i32 : i32, i32
  }
}

module attributes {stable_mosaic.version = 11 : i64} {
  func.func @fc_head_kernel(%arg0: i32, %arg1: memref<2x1024xf32, #tpu.memory_space<vmem>>, %arg2: memref<1024x512xbf16, #tpu.memory_space<vmem>>, %arg3: memref<1x512xf32, #tpu.memory_space<vmem>>, %arg4: memref<512x256xbf16, #tpu.memory_space<vmem>>, %arg5: memref<1x256xf32, #tpu.memory_space<vmem>>, %arg6: memref<256x128xbf16, #tpu.memory_space<vmem>>, %arg7: memref<1x128xf32, #tpu.memory_space<vmem>>, %arg8: memref<2x128xf32, #tpu.memory_space<vmem>>) attributes {dimension_semantics = [#tpu.dimension_semantics<arbitrary>], iteration_bounds = array<i64: 1>, scalar_prefetch = 0 : i64, scratch_operands = 0 : i64, tpu.core_type = #tpu.core_type<tc>, window_params = [{pipeline_mode = #tpu.pipeline_mode<synchronous>, transform_indices = @transform_0, window_bounds = array<i64: 2, 1024>}, {pipeline_mode = #tpu.pipeline_mode<synchronous>, transform_indices = @transform_1, window_bounds = array<i64: 1024, 512>}, {pipeline_mode = #tpu.pipeline_mode<synchronous>, transform_indices = @transform_2, window_bounds = array<i64: 1, 512>}, {pipeline_mode = #tpu.pipeline_mode<synchronous>, transform_indices = @transform_3, window_bounds = array<i64: 512, 256>}, {pipeline_mode = #tpu.pipeline_mode<synchronous>, transform_indices = @transform_4, window_bounds = array<i64: 1, 256>}, {pipeline_mode = #tpu.pipeline_mode<synchronous>, transform_indices = @transform_5, window_bounds = array<i64: 256, 128>}, {pipeline_mode = #tpu.pipeline_mode<synchronous>, transform_indices = @transform_6, window_bounds = array<i64: 1, 128>}, {pipeline_mode = #tpu.pipeline_mode<synchronous>, transform_indices = @transform_7, window_bounds = array<i64: 2, 128>}]} {
    %c0 = arith.constant 0 : index
    %c0_0 = arith.constant 0 : index
    %0 = vector.load %arg1[%c0, %c0_0] : memref<2x1024xf32, #tpu.memory_space<vmem>>, vector<2x1024xf32>
    %1 = arith.truncf %0 : vector<2x1024xf32> to vector<2x1024xbf16>
    %c0_1 = arith.constant 0 : index
    %c0_2 = arith.constant 0 : index
    %2 = vector.load %arg2[%c0_1, %c0_2] : memref<1024x512xbf16, #tpu.memory_space<vmem>>, vector<1024x512xbf16>
    %cst = arith.constant dense<0.000000e+00> : vector<2x512xf32>
    %3 = tpu.matmul %1, %2, %cst {dimension_numbers = #tpu.dot_dimension_numbers<[1], [0], [0], [1], [0, 0, 1, 1], [], []>} : vector<2x1024xbf16>, vector<1024x512xbf16>, vector<2x512xf32> -> vector<2x512xf32>
    %c0_3 = arith.constant 0 : index
    %c0_4 = arith.constant 0 : index
    %4 = vector.load %arg3[%c0_3, %c0_4] : memref<1x512xf32, #tpu.memory_space<vmem>>, vector<1x512xf32>
    %5 = vector.broadcast %4 : vector<1x512xf32> to vector<2x512xf32>
    %6 = arith.addf %3, %5 : vector<2x512xf32>
    %cst_5 = arith.constant 0.000000e+00 : f32
    %7 = vector.broadcast %cst_5 : f32 to vector<2x512xf32>
    %8 = arith.maximumf %6, %7 : vector<2x512xf32>
    %9 = arith.truncf %8 : vector<2x512xf32> to vector<2x512xbf16>
    %c0_6 = arith.constant 0 : index
    %c0_7 = arith.constant 0 : index
    %10 = vector.load %arg4[%c0_6, %c0_7] : memref<512x256xbf16, #tpu.memory_space<vmem>>, vector<512x256xbf16>
    %cst_8 = arith.constant dense<0.000000e+00> : vector<2x256xf32>
    %11 = tpu.matmul %9, %10, %cst_8 {dimension_numbers = #tpu.dot_dimension_numbers<[1], [0], [0], [1], [0, 0, 1, 1], [], []>} : vector<2x512xbf16>, vector<512x256xbf16>, vector<2x256xf32> -> vector<2x256xf32>
    %c0_9 = arith.constant 0 : index
    %c0_10 = arith.constant 0 : index
    %12 = vector.load %arg5[%c0_9, %c0_10] : memref<1x256xf32, #tpu.memory_space<vmem>>, vector<1x256xf32>
    %13 = vector.broadcast %12 : vector<1x256xf32> to vector<2x256xf32>
    %14 = arith.addf %11, %13 : vector<2x256xf32>
    %cst_11 = arith.constant 0.000000e+00 : f32
    %15 = vector.broadcast %cst_11 : f32 to vector<2x256xf32>
    %16 = arith.maximumf %14, %15 : vector<2x256xf32>
    %17 = arith.truncf %16 : vector<2x256xf32> to vector<2x256xbf16>
    %c0_12 = arith.constant 0 : index
    %c0_13 = arith.constant 0 : index
    %18 = vector.load %arg6[%c0_12, %c0_13] : memref<256x128xbf16, #tpu.memory_space<vmem>>, vector<256x128xbf16>
    %cst_14 = arith.constant dense<0.000000e+00> : vector<2x128xf32>
    %19 = tpu.matmul %17, %18, %cst_14 {dimension_numbers = #tpu.dot_dimension_numbers<[1], [0], [0], [1], [0, 0, 1, 1], [], []>} : vector<2x256xbf16>, vector<256x128xbf16>, vector<2x128xf32> -> vector<2x128xf32>
    %c0_15 = arith.constant 0 : index
    %c0_16 = arith.constant 0 : index
    %20 = vector.load %arg7[%c0_15, %c0_16] : memref<1x128xf32, #tpu.memory_space<vmem>>, vector<1x128xf32>
    %21 = vector.broadcast %20 : vector<1x128xf32> to vector<2x128xf32>
    %22 = arith.addf %19, %21 : vector<2x128xf32>
    %c0_17 = arith.constant 0 : index
    %c0_18 = arith.constant 0 : index
    %23 = vector.load %arg8[%c0_17, %c0_18] : memref<2x128xf32, #tpu.memory_space<vmem>>, vector<2x128xf32>
    tpu.vector_store %arg8[%c0_17, %c0_18], %22 {strides = array<i32>} : memref<2x128xf32, #tpu.memory_space<vmem>>, vector<2x128xf32>,
    return
  }
  func.func @transform_0(%arg0: i32) -> (i32, i32) {
    %c0_i32 = arith.constant 0 : i32
    %c0_i32_0 = arith.constant 0 : i32
    %c0_i32_1 = arith.constant 0 : i32
    return %c0_i32, %c0_i32_0 : i32, i32
  }
  func.func @transform_1(%arg0: i32) -> (i32, i32) {
    %c0_i32 = arith.constant 0 : i32
    %c0_i32_0 = arith.constant 0 : i32
    %c0_i32_1 = arith.constant 0 : i32
    return %c0_i32, %c0_i32_0 : i32, i32
  }
  func.func @transform_2(%arg0: i32) -> (i32, i32) {
    %c0_i32 = arith.constant 0 : i32
    %c0_i32_0 = arith.constant 0 : i32
    %c0_i32_1 = arith.constant 0 : i32
    return %c0_i32, %c0_i32_0 : i32, i32
  }
  func.func @transform_3(%arg0: i32) -> (i32, i32) {
    %c0_i32 = arith.constant 0 : i32
    %c0_i32_0 = arith.constant 0 : i32
    %c0_i32_1 = arith.constant 0 : i32
    return %c0_i32, %c0_i32_0 : i32, i32
  }
  func.func @transform_4(%arg0: i32) -> (i32, i32) {
    %c0_i32 = arith.constant 0 : i32
    %c0_i32_0 = arith.constant 0 : i32
    %c0_i32_1 = arith.constant 0 : i32
    return %c0_i32, %c0_i32_0 : i32, i32
  }
  func.func @transform_5(%arg0: i32) -> (i32, i32) {
    %c0_i32 = arith.constant 0 : i32
    %c0_i32_0 = arith.constant 0 : i32
    %c0_i32_1 = arith.constant 0 : i32
    return %c0_i32, %c0_i32_0 : i32, i32
  }
  func.func @transform_6(%arg0: i32) -> (i32, i32) {
    %c0_i32 = arith.constant 0 : i32
    %c0_i32_0 = arith.constant 0 : i32
    %c0_i32_1 = arith.constant 0 : i32
    return %c0_i32, %c0_i32_0 : i32, i32
  }
  func.func @transform_7(%arg0: i32) -> (i32, i32) {
    %c0_i32 = arith.constant 0 : i32
    %c0_i32_0 = arith.constant 0 : i32
    %c0_i32_1 = arith.constant 0 : i32
    return %c0_i32, %c0_i32_0 : i32, i32
  }
}

</mosaic_0001>

<bundles_post_ra>
// kernel: stn3d_forward.2
= control target key start
LH: loop header
LB: loop body
LE: loop exit
PB: predicated region body
PF: predicated region fallthrough
CT: control target
= control target key end

     0   :  { %12 = vsyncpa [#allocation3], 0  ;;  %s1878_s0 = inlined_call_operand.vmem [shape: f32[2,16,3], index: 0, kind: input, shape index: {}]   ;;  %s1879_s1 = inlined_call_operand.hbm [shape: f32[3,64], index: 1, kind: input, shape index: {}]   ;;  %s1880_s2 = inlined_call_operand.hbm [shape: f32[1,64], index: 2, kind: input, shape index: {}]   ;;  %s1881_s3 = inlined_call_operand.vmem [shape: bf16[64,128], index: 3, kind: input, shape index: {}]   ;;  %s1882_s4 = inlined_call_operand.hbm [shape: f32[1,128], index: 4, kind: input, shape index: {}]   ;;  %s1883_s5 = inlined_call_operand.vmem [shape: bf16[128,1024], index: 5, kind: input, shape index: {}]   ;;  %s1884_s6 = inlined_call_operand.hbm [shape: f32[1,1024], index: 6, kind: input, shape index: {}]   ;;  %s1885_s7 = inlined_call_operand.vmem [shape: f32[2,1024], index: 7, kind: output, shape index: {}]  }
   0x1   :  { %13 = vsyncpa [#allocation5], 0 }
   0x2   :  { %14 = vsyncpa [#allocation8], 0  ;;  %s1498_s24 = smov [#allocation4]   ;;  %s1499_s26 = smov [#allocation2]  }
   0x3   :  { %s33_s25 = sshll.u32 %s1498_s24, 4  ;;  %s23_s27 = sshll.u32 %s1499_s26, 4  ;;  %s34_s25 = int_to_ptr.vmem [resolvable:$true] %s33_s25  ;;  %s24_s27 = int_to_ptr.vmem [resolvable:$true] %s23_s27 }
   0x4   :  { %s1420_s28 = scalar_lea.vmem %s34_s25, 16  ;;  %s1424_s29 = scalar_lea.vmem %s34_s25, 32 }
   0x5   :  { %p1421_p0 = scmp.ne.s32.totalorder %s34_s25, %s1420_s28  ;;  %p1425_p1 = scmp.lt.s32.totalorder %s34_s25, %s34_s25 }
   0x6   :  { %p1426_p2 = scmp.lt.s32.totalorder %s1424_s29, %s1420_s28 }
   0x8   :  { %p1427_p3 = por %p1426_p2, %p1425_p1 }
   0xa   :  { %p1428_p4 = pnand %p1427_p3, %p1421_p0 }
   0xc   :  { %1431 = shalt.err (!%p1428_p4)
}
   0xd   :  { %36 = dma.hbm_to_vmem [thread:$0]  %s1880_s2, 16, %s34_s25, [#allocation5]  }
   0xe   :  { %s1440_s9 = scalar_lea.vmem %s24_s27, 64  ;;  %p1445_p6 = scmp.lt.s32.totalorder %s24_s27, %s24_s27 }
   0xf   :  { %p1441_p5 = scmp.ne.s32.totalorder %s24_s27, %s1440_s9  ;;  %p1446_p7 = scmp.lt.s32.totalorder %s1440_s9, %s1440_s9 }
  0x11   :  { %p1447_p8 = por %p1446_p7, %p1445_p6 }
  0x13   :  { %p1448_p9 = pnand %p1447_p8, %p1441_p5 }
  0x15   :  { %1451 = shalt.err (!%p1448_p9)
}
  0x16   :  { %26 = dma.hbm_to_vmem [thread:$0]  %s1879_s1, 64, %s24_s27, [#allocation3]  }
  0x17   :  { %s1500_s12 = smov [#allocation6]   ;;  %s1501_s14 = smov [#allocation7]  }
  0x18   :  { %s45_s13 = sshll.u32 %s1500_s12, 4  ;;  %s57_s15 = sshll.u32 %s1501_s14, 4  ;;  %s46_s13 = int_to_ptr.vmem [resolvable:$true] %s45_s13  ;;  %s58_s15 = int_to_ptr.vmem [resolvable:$true] %s57_s15 }
  0x19   :  { %s1460_s16 = scalar_lea.vmem %s46_s13, 16  ;;  %s1464_s2 = scalar_lea.vmem %s46_s13, 32 }
  0x1a   :  { %p1461_p10 = scmp.ne.s32.totalorder %s46_s13, %s1460_s16  ;;  %p1465_p11 = scmp.lt.s32.totalorder %s46_s13, %s46_s13 }
  0x1b   :  { %p1466_p12 = scmp.lt.s32.totalorder %s1464_s2, %s1460_s16 }
  0x1d   :  { %p1467_p13 = por %p1466_p12, %p1465_p11 }
  0x1f   :  { %p1468_p0 = pnand %p1467_p13, %p1461_p10 }
  0x21   :  { %1471 = shalt.err (!%p1468_p0)
}
  0x22   :  { %48 = dma.hbm_to_vmem [thread:$0]  %s1882_s4, 16, %s46_s13, [#allocation5]  }
  0x23   :  { %s1480_s19 = scalar_lea.vmem %s58_s15, 128  ;;  %p1485_p2 = scmp.lt.s32.totalorder %s58_s15, %s58_s15 }
  0x24   :  { %p1481_p1 = scmp.ne.s32.totalorder %s58_s15, %s1480_s19  ;;  %p1486_p3 = scmp.lt.s32.totalorder %s1480_s19, %s1480_s19 }
  0x26   :  { %p1487_p4 = por %p1486_p3, %p1485_p2 }
  0x28   :  { %p1488_p5 = pnand %p1487_p4, %p1481_p1 }
  0x2a   :  { %1491 = shalt.err (!%p1488_p5)
}
  0x2b   :  { %60 = dma.hbm_to_vmem [thread:$0]  %s1884_s6, 128, %s58_s15, [#allocation8]  }
  0x2c   :  { %1492 = dma.done.wait [#allocation3], 64  }
  0x2d   :  { %1493 = vsyncadd [#allocation3], 4294967232 }
  0x2e   :  { %1494 = dma.done.wait [#allocation5], 32  }
  0x2f   :  { %1495 = vsyncadd [#allocation5], 4294967264 }
  0x30   :  { %1496 = dma.done.wait [#allocation8], 128  }
  0x31   :  { %1497 = vsyncadd [#allocation8], 4294967168  ;;  %v1502_v0 = vmov 1   ;;  %v1503_v1 = vmov 0   ;;  %v74_v2 = vld [vmem:[%s1878_s0] sm:$0xff]  ;;  %v75_v3 = vld [vmem:[%s1878_s0 + $0x8] sm:$0xff] }
  0x32   :  { %1402 = vset.pattern.permute.xlu1 %v1502_v0  ;;  %1401 = vset.pattern.permute.xlu0 %v1503_v1  ;;  %v76_v4 = vld [vmem:[%s1878_s0 + $0x10] sm:$0xff]  ;;  %v77_v5 = vld [vmem:[%s1878_s0 + $0x18] sm:$0xff]  ;;  %v1504_v7 = vmov 2   ;;  %v1410_v9 = vld [vmem:[%s1881_s3 + $0x8] sm:$0xff]   ;;  %vm221_vm0 = vcmask 523264   ;;  %vm1158_vm1 = vcmask 1041409  }
  0x33   :  { %741 = vmatprep.mubr.bf16.mxu1 %v1503_v1  ;;  %109 = vperm.xlu1 %1402, %v74_v2   ;;  %v1408_v6 = vld [vmem:[%s1881_s3 + $0x18] sm:$0xff]   ;;  %v1409_v8 = vld [vmem:[%s1881_s3 + $0x10] sm:$0xff]   ;;  %v1411_v10 = vld [vmem:[%s1881_s3] sm:$0xff]   ;;  %vm1160_vm2 = vcmask 1043459   ;;  %vm1162_vm3 = vcmask 1045509   ;;  %vm1164_vm4 = vcmask 1047559  }
  0x34   :  { %81 = vperm.xlu0 %1401, %v74_v2   ;;  %1381 = vmatprep.subr.bf16.mxu0 %v1408_v6  ;;  %v339_v11 = vld [vmem:[%s1883_s5 + $0x1c0] sm:$0xff]  ;;  %v1594_v13 = vld [vmem:[%s1883_s5 + $0x1c8] sm:$0xff] }
  0x35   :  { %1382 = vmatpush3.bf16.msra.mxu0 %v1408_v6  ;;  %v343_v12 = vld [vmem:[%s1883_s5 + $0x1e0] sm:$0xff]  ;;  %v1599_v15 = vld [vmem:[%s1883_s5 + $0x1e8] sm:$0xff] }
  0x36   :  { %1383 = vmatprep.subr.bf16.mxu0 %v1409_v8  ;;  %v1368_v14 = vcombine.high %v339_v11, %v343_v12  ;;  %v1367_v16 = vcombine.low %v339_v11, %v343_v12  ;;  %v331_v17 = vld [vmem:[%s1883_s5 + $0x180] sm:$0xff]  ;;  %v1369_v19 = vcombine.low %v1594_v13, %v1599_v15  ;;  %v1370_v20 = vcombine.high %v1594_v13, %v1599_v15  ;;  %v308_v13 = vld [vmem:[%s1883_s5 + $0xc8] sm:$0xff] }
  0x37   :  { %113 = vperm.xlu1 %1402, %v75_v3   ;;  %v335_v18 = vld [vmem:[%s1883_s5 + $0x1a0] sm:$0xff]  ;;  %v312_v15 = vld [vmem:[%s1883_s5 + $0xe8] sm:$0xff] }
  0x38   :  { %86 = vperm.xlu0 %1401, %v75_v3   ;;  %v1360_v21 = vcombine.high %v331_v17, %v335_v18  ;;  %709 = vmatprep.subr.bf16.mxu1 %v1368_v14  ;;  %v1359_v22 = vcombine.low %v331_v17, %v335_v18  ;;  %v323_v23 = vld [vmem:[%s1883_s5 + $0x140] sm:$0xff]  ;;  %v332_v17 = vld [vmem:[%s1883_s5 + $0x188] sm:$0xff] }
  0x39   :  { %1384 = vmatpush3.bf16.msra.mxu0 %v1409_v8  ;;  %710 = vmatpush1.bf16.msra.mxu1 %v1367_v16  ;;  %v327_v24 = vld [vmem:[%s1883_s5 + $0x160] sm:$0xff]  ;;  %v336_v18 = vld [vmem:[%s1883_s5 + $0x1a8] sm:$0xff] }
  0x3a   :  { %1385 = vmatprep.subr.bf16.mxu0 %v1410_v9  ;;  %711 = vmatprep.subr.bf16.mxu1 %v1360_v21  ;;  %v1352_v25 = vcombine.high %v323_v23, %v327_v24  ;;  %v1351_v26 = vcombine.low %v323_v23, %v327_v24  ;;  %v315_v27 = vld [vmem:[%s1883_s5 + $0x100] sm:$0xff]  ;;  %v1362_v23 = vcombine.high %v332_v17, %v336_v18  ;;  %v324_v24 = vld [vmem:[%s1883_s5 + $0x148] sm:$0xff] }
  0x3b   :  { %1403 = vset.pattern.permute.xlu1 %v1503_v1  ;;  %v319_v28 = vld [vmem:[%s1883_s5 + $0x120] sm:$0xff] }
  0x3c   :  { %91 = vperm.xlu0 %1401, %v76_v4   ;;  %96 = vperm.xlu1 %1403, %v77_v5   ;;  %v1344_v29 = vcombine.high %v315_v27, %v319_v28  ;;  %v1343_v30 = vcombine.low %v315_v27, %v319_v28  ;;  %v307_v31 = vld [vmem:[%s1883_s5 + $0xc0] sm:$0xff]  ;;  %v316_v28 = vld [vmem:[%s1883_s5 + $0x108] sm:$0xff] }
  0x3d   :  { %1386 = vmatpush3.bf16.msra.mxu0 %v1410_v9  ;;  %712 = vmatpush1.bf16.msra.mxu1 %v1359_v22  ;;  %v311_v32 = vld [vmem:[%s1883_s5 + $0xe0] sm:$0xff] }
  0x3e   :  { %1387 = vmatprep.subr.bf16.mxu0 %v1411_v10  ;;  %713 = vmatprep.subr.bf16.mxu1 %v1352_v25  ;;  %v1336_v33 = vcombine.high %v307_v31, %v311_v32  ;;  %v1335_v34 = vcombine.low %v307_v31, %v311_v32  ;;  %v1301_v41 = vld [vmem:[#allocation2 + $0x1] ss:$0 sm:$0xff]  ;;  %v1300_v42 = vld [vmem:[#allocation2] ss:$0 sm:$0xff]  ;;  %v1302_v49 = vld [vmem:[#allocation2 + $0x2] ss:$0 sm:$0xff]  ;;  %v1338_v32 = vcombine.high %v308_v13, %v312_v15 }
  0x3f   :  { %v1303_v57 = vld [vmem:[#allocation4] ss:$0 sm:$0xff]  ;;  %v328_v25 = vld [vmem:[%s1883_s5 + $0x168] sm:$0xff] }
  0x40   :  { %1404 = vset.pattern.permute.xlu0 %v1502_v0  ;;  %1405 = vset.pattern.permute.xlu1 %v1502_v0  ;;  %v1354_v27 = vcombine.high %v324_v24, %v328_v25 }
  0x41   :  { %117 = vperm.xlu0 %1404, %v76_v4   ;;  %121 = vperm.xlu1 %1405, %v77_v5  }
  0x42   :  { %1388 = vmatpush3.bf16.msra.mxu0 %v1411_v10  ;;  %714 = vmatpush1.bf16.msra.mxu1 %v1351_v26  ;;  %v1361_v26 = vcombine.low %v332_v17, %v336_v18 }
  0x43   :  { %762 = vmatprep.subr.bf16.mxu0 %v1370_v20  ;;  %715 = vmatprep.subr.bf16.mxu1 %v1344_v29  ;;  %v320_v29 = vld [vmem:[%s1883_s5 + $0x128] sm:$0xff] }
  0x44   :  { %v1346_v31 = vcombine.high %v316_v28, %v320_v29 }
  0x45   :  { %1407 = vset.pattern.permute.xlu0 %v1504_v7  ;;  %1406 = vset.pattern.permute.xlu1 %v1504_v7 }
  0x46   :  { %142 = vperm.xlu0 %1407, %v75_v3   ;;  %138 = vperm.xlu1 %1406, %v74_v2  }
  0x47   :  { %716 = vmatpush1.bf16.msra.mxu1 %v1343_v30  ;;  %v1353_v30 = vcombine.low %v324_v24, %v328_v25  ;;  %v329_v24 = vld [vmem:[%s1883_s5 + $0x170] sm:$0xff]  ;;  %v326_v25 = vld [vmem:[%s1883_s5 + $0x158] sm:$0xff] }
  0x48   :  { %717 = vmatprep.subr.bf16.mxu1 %v1336_v33  ;;  %v1337_v33 = vcombine.low %v308_v13, %v312_v15  ;;  %v317_v15 = vld [vmem:[%s1883_s5 + $0x110] sm:$0xff] }
  0x4a   :  { %146 = vperm.xlu1 %1406, %v76_v4  }
  0x4b   :  { %718 = vmatpush1.bf16.msra.mxu1 %v1335_v34  ;;  %v299_v34 = vld [vmem:[%s1883_s5 + $0x80] sm:$0xff] }
  0x4e   :  { %150 = vperm.xlu1 %1406, %v77_v5  }
  0xae   :  { %v110_v35 = vpop.permute.xlu1 %109 }
  0xaf   :  { %v82_v36 = vpop.permute.xlu0 %81  ;;  %v128_v47 = vmul.f32 %v1301_v41, %v110_v35  ;;  %v303_v35 = vld [vmem:[%s1883_s5 + $0xa0] sm:$0xff] }
  0xb0   :  { %v103_v48 = vmul.f32 %v1300_v42, %v82_v36  ;;  %v300_v36 = vld [vmem:[%s1883_s5 + $0x88] sm:$0xff] }
  0xb2   :  { %v114_v37 = vpop.permute.xlu1 %113  ;;  %v132_v54 = vadd.f32 %v128_v47, %v103_v48 }
  0xb3   :  { %v87_v38 = vpop.permute.xlu0 %86  ;;  %v129_v45 = vmul.f32 %v1301_v41, %v114_v37  ;;  %v1328_v37 = vcombine.high %v299_v34, %v303_v35 }
  0xb4   :  { %v104_v46 = vmul.f32 %v1300_v42, %v87_v38  ;;  %v304_v38 = vld [vmem:[%s1883_s5 + $0xa8] sm:$0xff] }
  0xb5   :  { %719 = vmatprep.subr.bf16.mxu1 %v1328_v37 }
  0xb6   :  { %v133_v51 = vadd.f32 %v129_v45, %v104_v46  ;;  %v296_v46 = vld [vmem:[%s1883_s5 + $0x68] sm:$0xff] }
  0xb7   :  { %v92_v39 = vpop.permute.xlu0 %91  ;;  %v97_v40 = vpop.permute.xlu1 %96 }
  0xb8   :  { %v105_v59 = vmul.f32 %v1300_v42, %v92_v39  ;;  %v106_v5 = vmul.f32 %v1300_v42, %v97_v40  ;;  %v1329_v39 = vcombine.low %v300_v36, %v304_v38  ;;  %v1330_v40 = vcombine.high %v300_v36, %v304_v38  ;;  %v291_v42 = vld [vmem:[%s1883_s5 + $0x40] sm:$0xff] }
  0xbc   :  { %v118_v43 = vpop.permute.xlu0 %117  ;;  %v122_v44 = vpop.permute.xlu1 %121 }
  0xbd   :  { %v130_v55 = vmul.f32 %v1301_v41, %v118_v43  ;;  %v131_v0 = vmul.f32 %v1301_v41, %v122_v44  ;;  %v1327_v41 = vcombine.low %v299_v34, %v303_v35  ;;  %v295_v43 = vld [vmem:[%s1883_s5 + $0x60] sm:$0xff]  ;;  %v292_v44 = vld [vmem:[%s1883_s5 + $0x48] sm:$0xff] }
  0xbe   :  { %v1320_v45 = vcombine.high %v291_v42, %v295_v43  ;;  %v1321_v47 = vcombine.low %v292_v44, %v296_v46  ;;  %v1322_v48 = vcombine.high %v292_v44, %v296_v46 }
  0xbf   :  { %v134_v63 = vadd.f32 %v130_v55, %v105_v59  ;;  %v135_v9 = vadd.f32 %v131_v0, %v106_v5  ;;  %720 = vmatpush1.bf16.msra.mxu1 %v1327_v41  ;;  %v345_v59 = vld [vmem:[%s1883_s5 + $0x1f0] sm:$0xff]  ;;  %v1304_v5 = vld [vmem:[#allocation6] ss:$0 sm:$0xff] }
  0xc0   :  { %721 = vmatprep.subr.bf16.mxu1 %v1320_v45  ;;  %v313_v41 = vld [vmem:[%s1883_s5 + $0xf0] sm:$0xff] }
  0xc1   :  { %v143_v50 = vpop.permute.xlu0 %142  ;;  %v139_v53 = vpop.permute.xlu1 %138 }
  0xc2   :  { %v158_v52 = vmul.f32 %v1302_v49, %v143_v50  ;;  %v157_v56 = vmul.f32 %v1302_v49, %v139_v53  ;;  %v283_v50 = vld [vmem:[%s1883_s5] sm:$0xff] }
  0xc4   :  { %v162_v58 = vadd.f32 %v158_v52, %v133_v51  ;;  %v161_v60 = vadd.f32 %v157_v56, %v132_v54  ;;  %v287_v51 = vld [vmem:[%s1883_s5 + $0x20] sm:$0xff]  ;;  %v284_v52 = vld [vmem:[%s1883_s5 + $0x8] sm:$0xff] }
  0xc5   :  { %v147_v61 = vpop.permute.xlu1 %146  ;;  %v1312_v53 = vcombine.high %v283_v50, %v287_v51  ;;  %v288_v54 = vld [vmem:[%s1883_s5 + $0x28] sm:$0xff] }
  0xc6   :  { %v173_v62 = vadd.f32 %v1303_v57, %v162_v58  ;;  %v159_v2 = vmul.f32 %v1302_v49, %v147_v61  ;;  %v172_v3 = vadd.f32 %v1303_v57, %v161_v60  ;;  %v1313_v55 = vcombine.low %v284_v52, %v288_v54  ;;  %v341_v58 = vld [vmem:[%s1883_s5 + $0x1d0] sm:$0xff]  ;;  %v342_v60 = vld [vmem:[%s1883_s5 + $0x1d8] sm:$0xff] }
  0xc7   :  { %v1314_v56 = vcombine.high %v284_v52, %v288_v54  ;;  %v1372_v61 = vcombine.high %v341_v58, %v345_v59 }
  0xc8   :  { %v177_v4 = vmax.f32 %v173_v62, 0.0  ;;  %v163_v6 = vadd.f32 %v159_v2, %v134_v63  ;;  %v176_v7 = vmax.f32 %v172_v3, 0.0  ;;  %v346_v62 = vld [vmem:[%s1883_s5 + $0x1f8] sm:$0xff]  ;;  %v1371_v63 = vcombine.low %v341_v58, %v345_v59 }
  0xc9   :  { %v151_v8 = vpop.permute.xlu1 %150  ;;  %v1373_v0 = vcombine.low %v342_v60, %v346_v62  ;;  %v1374_v2 = vcombine.high %v342_v60, %v346_v62  ;;  %v294_v58 = vld [vmem:[%s1883_s5 + $0x58] sm:$0xff] }
  0xca   :  { %v160_v10 = vmul.f32 %v1302_v49, %v151_v8  ;;  %v180_v11 = vpack.c.bf16 %v177_v4, %v176_v7  ;;  %v174_v12 = vadd.f32 %v1303_v57, %v163_v6  ;;  %v1319_v49 = vcombine.low %v291_v42, %v295_v43  ;;  %v310_v42 = vld [vmem:[%s1883_s5 + $0xd8] sm:$0xff] }
  0xcb   :  { %v314_v43 = vld [vmem:[%s1883_s5 + $0xf8] sm:$0xff] }
  0xcc   :  { %v164_v14 = vadd.f32 %v160_v10, %v135_v9  ;;  %1389 = vmatprep.mubr.msk.bf16.mxu0 %vm221_vm0, %v180_v11  ;;  %v178_v20 = vmax.f32 %v174_v12, 0.0  ;;  %722 = vmatpush1.bf16.msra.mxu1 %v1319_v49  ;;  %v333_v10 = vld [vmem:[%s1883_s5 + $0x190] sm:$0xff]  ;;  %v334_v12 = vld [vmem:[%s1883_s5 + $0x198] sm:$0xff] }
  0xcd   :  { %723 = vmatprep.subr.bf16.mxu1 %v1312_v53  ;;  %v337_v11 = vld [vmem:[%s1883_s5 + $0x1b0] sm:$0xff]  ;;  %v1341_v53 = vcombine.low %v310_v42, %v314_v43  ;;  %v298_v59 = vld [vmem:[%s1883_s5 + $0x78] sm:$0xff] }
  0xce   :  { %v175_v16 = vadd.f32 %v1303_v57, %v164_v14  ;;  %v1311_v57 = vcombine.low %v283_v50, %v287_v51  ;;  %v338_v14 = vld [vmem:[%s1883_s5 + $0x1b8] sm:$0xff]  ;;  %v305_v49 = vld [vmem:[%s1883_s5 + $0xb0] sm:$0xff] }
  0xcf   :  { %v302_v50 = vld [vmem:[%s1883_s5 + $0x98] sm:$0xff] }
  0xd0   :  { %v179_v21 = vmax.f32 %v175_v16, 0.0  ;;  %724 = vmatpush1.bf16.msra.mxu1 %v1311_v57  ;;  %v306_v51 = vld [vmem:[%s1883_s5 + $0xb8] sm:$0xff]  ;;  %v297_v57 = vld [vmem:[%s1883_s5 + $0x70] sm:$0xff] }
  0xd1   :  { %815 = vmatprep.subr.bf16.mxu1 %v1372_v61  ;;  %v1333_v61 = vcombine.low %v302_v50, %v306_v51 }
  0xd2   :  { %v181_v22 = vpack.c.bf16 %v179_v21, %v178_v20  ;;  %v1364_v21 = vcombine.high %v333_v10, %v337_v11 }
  0xd4   :  { %1390 = vmatmul.mubr.msk.bf16.vlgmr.msra.gmra.mxu0 %vm221_vm0, %v181_v22  ;;  %v1366_v22 = vcombine.high %v334_v12, %v338_v14 }
  0xd5   :  { %763 = vmatpush1.bf16.msra.mxu0 %v1369_v19  ;;  %794 = vmatprep.mubr.bf16.mxu0 %v1503_v1  ;;  %v1345_v19 = vcombine.low %v316_v28, %v320_v29  ;;  %v1363_v28 = vcombine.low %v333_v10, %v337_v11  ;;  %v1365_v29 = vcombine.low %v334_v12, %v338_v14  ;;  %v349_v11 = vlaneseq }
  0xd6   :  { %764 = vmatprep.subr.bf16.mxu0 %v1362_v23  ;;  %v325_v23 = vld [vmem:[%s1883_s5 + $0x150] sm:$0xff] }
  0xd7   :  { %v1355_v35 = vcombine.low %v325_v23, %v329_v24  ;;  %v1809_v12 = vshrl.u32 %v349_v11, 7 }
  0xd9   :  { %765 = vmatpush1.bf16.msra.mxu0 %v1361_v26  ;;  %v330_v26 = vld [vmem:[%s1883_s5 + $0x178] sm:$0xff]  ;;  %v351_v14 = vsub.s32 0, %v1809_v12 }
  0xda   :  { %766 = vmatprep.subr.bf16.mxu0 %v1354_v27  ;;  %v1358_v13 = vcombine.high %v326_v25, %v330_v26  ;;  %v1357_v36 = vcombine.low %v326_v25, %v330_v26 }
  0xdd   :  { %767 = vmatpush1.bf16.msra.mxu0 %v1353_v30 }
  0xde   :  { %768 = vmatprep.subr.bf16.mxu0 %v1346_v31  ;;  %v1356_v31 = vcombine.high %v325_v23, %v329_v24 }
  0xe1   :  { %769 = vmatpush1.bf16.msra.mxu0 %v1345_v19  ;;  %v321_v19 = vld [vmem:[%s1883_s5 + $0x130] sm:$0xff] }
  0xe2   :  { %770 = vmatprep.subr.bf16.mxu0 %v1338_v32  ;;  %v318_v32 = vld [vmem:[%s1883_s5 + $0x118] sm:$0xff]  ;;  %v1348_v38 = vcombine.high %v317_v15, %v321_v19  ;;  %v1347_v44 = vcombine.low %v317_v15, %v321_v19 }
  0xe5   :  { %771 = vmatpush1.bf16.msra.mxu0 %v1337_v33  ;;  %v322_v33 = vld [vmem:[%s1883_s5 + $0x138] sm:$0xff] }
  0xe6   :  { %772 = vmatprep.subr.bf16.mxu0 %v1330_v40  ;;  %v309_v40 = vld [vmem:[%s1883_s5 + $0xd0] sm:$0xff]  ;;  %v1349_v45 = vcombine.low %v318_v32, %v322_v33 }
  0xe7   :  { %v1340_v46 = vcombine.high %v309_v40, %v313_v41  ;;  %v1339_v52 = vcombine.low %v309_v40, %v313_v41 }
  0xe9   :  { %773 = vmatpush1.bf16.msra.mxu0 %v1329_v39  ;;  %v1350_v39 = vcombine.high %v318_v32, %v322_v33 }
  0xea   :  { %774 = vmatprep.subr.bf16.mxu0 %v1322_v48  ;;  %v301_v48 = vld [vmem:[%s1883_s5 + $0x90] sm:$0xff] }
  0xeb   :  { %v1332_v54 = vcombine.high %v301_v48, %v305_v49  ;;  %v1331_v60 = vcombine.low %v301_v48, %v305_v49 }
  0xed   :  { %775 = vmatpush1.bf16.msra.mxu0 %v1321_v47  ;;  %v1342_v47 = vcombine.high %v310_v42, %v314_v43 }
  0xee   :  { %776 = vmatprep.subr.bf16.mxu0 %v1314_v56  ;;  %v293_v56 = vld [vmem:[%s1883_s5 + $0x50] sm:$0xff] }
  0xef   :  { %v1324_v62 = vcombine.high %v293_v56, %v297_v57 }
  0xf1   :  { %777 = vmatpush1.bf16.msra.mxu0 %v1313_v55  ;;  %v1334_v55 = vcombine.high %v302_v50, %v306_v51 }
  0xf2   :  { %868 = vmatprep.subr.bf16.mxu0 %v1374_v2  ;;  %v289_v2 = vld [vmem:[%s1883_s5 + $0x30] sm:$0xff] }
 0x194   :  { %v1391_v3 = vpop.f32.mrf.mxu0 }
 0x195   :  { %v271_v27 = vadd.f32 %v1391_v3, %v1304_v5  ;;  %v286_v3 = vld [vmem:[%s1883_s5 + $0x18] sm:$0xff] }
 0x196   :  { %v262_v4 = vpop.f32.mrf.mxu0 }
 0x197   :  { %v263_v7 = vadd.f32 %v1304_v5, %v262_v4  ;;  %v279_v34 = vmax.f32 %v271_v27, 0.0  ;;  %v290_v4 = vld [vmem:[%s1883_s5 + $0x38] sm:$0xff] }
 0x198   :  { %v1392_v6 = vpop.f32.mrf.mxu0  ;;  %v1317_v10 = vcombine.low %v286_v3, %v290_v4 }
 0x199   :  { %v277_v16 = vmax.f32 %v263_v7, 0.0  ;;  %v274_v18 = vadd.f32 %v1392_v6, %v1304_v5  ;;  %v1325_v6 = vcombine.low %v294_v58, %v298_v59 }
 0x19a   :  { %v265_v8 = vpop.f32.mrf.mxu0 }
 0x19b   :  { %v266_v9 = vadd.f32 %v1304_v5, %v265_v8  ;;  %v280_v30 = vmax.f32 %v274_v18, 0.0  ;;  %v1323_v5 = vcombine.low %v293_v56, %v297_v57  ;;  %v1318_v8 = vcombine.high %v286_v3, %v290_v4 }
 0x19c   :  { %v355_v18 = vsub.s32 1, %v1809_v12 }
 0x19d   :  { %v278_v17 = vmax.f32 %v266_v9, 0.0  ;;  %v1749_v37 = vpack.c.bf16 %v280_v30, %v279_v34 }
 0x19f   :  { %v1719_v20 = vpack.c.bf16 %v278_v17, %v277_v16  ;;  %v359_v16 = vsub.s32 2, %v1809_v12  ;;  %v1813_v17 = vld [vmem:[#allocation7] sm:$0xff] }
 0x1a0   :  { %v356_v24 = vrot.slane %v1813_v17, %v355_v18 }
 0x1a1   :  { %742 = vmatmul.mubr.bf16.vlgmr.msra.gmra.mxu1 %v1719_v20  ;;  %795 = vmatmul.mubr.bf16.vlgmr.msra.gmra.mxu0 %v1719_v20 }
 0x1a2   :  { %816 = vmatpush1.bf16.msra.mxu1 %v1371_v63  ;;  %869 = vmatpush1.bf16.msra.mxu0 %v1373_v0  ;;  %v1326_v63 = vcombine.high %v294_v58, %v298_v59  ;;  %v285_v0 = vld [vmem:[%s1883_s5 + $0x10] sm:$0xff] }
 0x1a3   :  { %817 = vmatprep.subr.bf16.mxu1 %v1364_v21  ;;  %870 = vmatprep.subr.bf16.mxu0 %v1366_v22  ;;  %v1316_v7 = vcombine.high %v285_v0, %v289_v2  ;;  %v1315_v9 = vcombine.low %v285_v0, %v289_v2  ;;  %v352_v21 = vrot.slane %v1813_v17, %v351_v14 }
 0x1a4   :  { %751 = vmatprep.mubr.bf16.mxu1 %v1503_v1  ;;  %804 = vmatprep.mubr.bf16.mxu0 %v1503_v1 }
 0x1a6   :  { %818 = vmatpush1.bf16.msra.mxu1 %v1363_v28  ;;  %871 = vmatpush1.bf16.msra.mxu0 %v1365_v29 }
 0x1a7   :  { %819 = vmatprep.subr.bf16.mxu1 %v1356_v31  ;;  %872 = vmatprep.subr.bf16.mxu0 %v1358_v13 }
 0x1a9   :  { %752 = vmatmul.mubr.bf16.gmra.mxu1 %v1749_v37  ;;  %805 = vmatmul.mubr.bf16.gmra.mxu0 %v1749_v37 }
 0x1aa   :  { %820 = vmatpush1.bf16.msra.mxu1 %v1355_v35  ;;  %873 = vmatpush1.bf16.msra.mxu0 %v1357_v36 }
 0x1ab   :  { %821 = vmatprep.subr.bf16.mxu1 %v1348_v38  ;;  %874 = vmatprep.subr.bf16.mxu0 %v1350_v39 }
 0x1ac   :  { %847 = vmatprep.mubr.bf16.mxu1 %v1503_v1  ;;  %900 = vmatprep.mubr.bf16.mxu0 %v1503_v1 }
 0x1ae   :  { %822 = vmatpush1.bf16.msra.mxu1 %v1347_v44  ;;  %875 = vmatpush1.bf16.msra.mxu0 %v1349_v45 }
 0x1af   :  { %823 = vmatprep.subr.bf16.mxu1 %v1340_v46  ;;  %876 = vmatprep.subr.bf16.mxu0 %v1342_v47 }
 0x1b2   :  { %824 = vmatpush1.bf16.msra.mxu1 %v1339_v52  ;;  %877 = vmatpush1.bf16.msra.mxu0 %v1341_v53 }
 0x1b3   :  { %825 = vmatprep.subr.bf16.mxu1 %v1332_v54  ;;  %878 = vmatprep.subr.bf16.mxu0 %v1334_v55 }
 0x1b6   :  { %826 = vmatpush1.bf16.msra.mxu1 %v1331_v60  ;;  %879 = vmatpush1.bf16.msra.mxu0 %v1333_v61 }
 0x1b7   :  { %827 = vmatprep.subr.bf16.mxu1 %v1324_v62  ;;  %880 = vmatprep.subr.bf16.mxu0 %v1326_v63 }
 0x1ba   :  { %828 = vmatpush1.bf16.msra.mxu1 %v1323_v5  ;;  %881 = vmatpush1.bf16.msra.mxu0 %v1325_v6 }
 0x1bb   :  { %829 = vmatprep.subr.bf16.mxu1 %v1316_v7  ;;  %882 = vmatprep.subr.bf16.mxu0 %v1318_v8 }
 0x1be   :  { %830 = vmatpush1.bf16.msra.mxu1 %v1315_v9  ;;  %883 = vmatpush1.bf16.msra.mxu0 %v1317_v10 }
 0x1c1   :  { %848 = vmatmul.mubr.bf16.vlgmr.msra.gmra.mxu1 %v1719_v20  ;;  %901 = vmatmul.mubr.bf16.vlgmr.msra.gmra.mxu0 %v1719_v20  ;;  %v363_v20 = vsub.s32 3, %v1809_v12 }
 0x1c2   :  { %857 = vmatprep.mubr.bf16.mxu1 %v1503_v1  ;;  %910 = vmatprep.mubr.bf16.mxu0 %v1503_v1  ;;  %v360_v1 = vrot.slane %v1813_v17, %v359_v16 }
 0x1c3   :  { %v364_v25 = vrot.slane %v1813_v17, %v363_v20 }
 0x1c9   :  { %858 = vmatmul.mubr.bf16.gmra.mxu1 %v1749_v37  ;;  %911 = vmatmul.mubr.bf16.gmra.mxu0 %v1749_v37 }
 0x261   :  { %v743_v22 = vpop.f32.mrf.mxu1  ;;  %v796_v23 = vpop.f32.mrf.mxu0 }
 0x262   :  { %v744_v26 = vadd.f32 %v743_v22, %v352_v21  ;;  %v797_v27 = vadd.f32 %v796_v23, %v360_v1 }
 0x263   :  { %v745_v28 = vpop.f32.mrf.mxu1  ;;  %v798_v29 = vpop.f32.mrf.mxu0 }
 0x264   :  { %v746_v30 = vadd.f32 %v745_v28, %v356_v24  ;;  %v799_v31 = vadd.f32 %v798_v29, %v364_v25  ;;  %v921_v33 = vmax.f32 %v744_v26, 0.0  ;;  %v923_v34 = vmax.f32 %v797_v27, 0.0 }
 0x265   :  { %v747_v13 = vpop.f32.mrf.mxu1  ;;  %v800_v15 = vpop.f32.mrf.mxu0 }
 0x266   :  { %v748_v19 = vadd.f32 %v747_v13, %v352_v21  ;;  %v801_v32 = vadd.f32 %v800_v15, %v360_v1  ;;  %v922_v41 = vmax.f32 %v746_v30, 0.0  ;;  %v924_v42 = vmax.f32 %v799_v31, 0.0 }
 0x267   :  { %v749_v35 = vpop.f32.mrf.mxu1  ;;  %v802_v36 = vpop.f32.mrf.mxu0 }
 0x268   :  { %v929_v37 = vmax.f32 %v748_v19, 0.0  ;;  %v931_v38 = vmax.f32 %v801_v32, 0.0  ;;  %v750_v39 = vadd.f32 %v749_v35, %v356_v24  ;;  %v803_v40 = vadd.f32 %v802_v36, %v364_v25 }
 0x269   :  { %v753_v43 = vpop.f32.mrf.mxu1  ;;  %v806_v44 = vpop.f32.mrf.mxu0 }
 0x26a   :  { %v953_v45 = vmax.f32 %v921_v33, %v929_v37  ;;  %v967_v46 = vmax.f32 %v923_v34, %v931_v38  ;;  %v930_v47 = vmax.f32 %v750_v39, 0.0  ;;  %v932_v48 = vmax.f32 %v803_v40, 0.0 }
 0x26b   :  { %v754_v49 = vadd.f32 %v753_v43, %v352_v21  ;;  %v807_v50 = vadd.f32 %v806_v44, %v360_v1  ;;  %v755_v51 = vpop.f32.mrf.mxu1  ;;  %v808_v52 = vpop.f32.mrf.mxu0  ;;  %v1505_v38 = vmov 1983009808  }
 0x26c   :  { %v954_v53 = vrot.slane %v953_v45, 4  ;;  %v968_v54 = vrot.slane %v967_v46, 4  ;;  %v960_v55 = vmax.f32 %v922_v41, %v930_v47  ;;  %v974_v56 = vmax.f32 %v924_v42, %v932_v48 }
 0x26d   :  { %v756_v57 = vadd.f32 %v755_v51, %v356_v24  ;;  %v809_v58 = vadd.f32 %v808_v52, %v364_v25  ;;  %v757_v59 = vpop.f32.mrf.mxu1  ;;  %v810_v60 = vpop.f32.mrf.mxu0  ;;  %v937_v2 = vmax.f32 %v754_v49, 0.0  ;;  %v939_v3 = vmax.f32 %v807_v50, 0.0 }
 0x26e   :  { %v955_v61 = vmax.f32 %v953_v45, %v954_v53  ;;  %v969_v62 = vmax.f32 %v967_v46, %v968_v54  ;;  %v961_v63 = vrot.slane %v960_v55, 4  ;;  %v975_v0 = vrot.slane %v974_v56, 4 }
 0x26f   :  { %v758_v4 = vadd.f32 %v757_v59, %v352_v21  ;;  %v811_v5 = vadd.f32 %v810_v60, %v360_v1  ;;  %v759_v6 = vpop.f32.mrf.mxu1  ;;  %v812_v7 = vpop.f32.mrf.mxu0  ;;  %v938_v10 = vmax.f32 %v756_v57, 0.0  ;;  %v940_v11 = vmax.f32 %v809_v58, 0.0 }
 0x270   :  { %v962_v8 = vmax.f32 %v960_v55, %v961_v63  ;;  %v976_v9 = vmax.f32 %v974_v56, %v975_v0  ;;  %v760_v18 = vadd.f32 %v759_v6, %v356_v24  ;;  %v813_v20 = vadd.f32 %v812_v7, %v364_v25 }
 0x271   :  { %v945_v14 = vmax.f32 %v758_v4, 0.0  ;;  %v947_v16 = vmax.f32 %v811_v5, 0.0  ;;  %v956_v22 = vrot.slane %v955_v61, 2  ;;  %v970_v23 = vrot.slane %v969_v62, 2 }
 0x272   :  { %v963_v26 = vrot.slane %v962_v8, 2  ;;  %v977_v27 = vrot.slane %v976_v9, 2  ;;  %v946_v30 = vmax.f32 %v760_v18, 0.0  ;;  %v948_v31 = vmax.f32 %v813_v20, 0.0 }
 0x273   :  { %v1009_v28 = vmax.f32 %v937_v2, %v945_v14  ;;  %v1023_v29 = vmax.f32 %v939_v3, %v947_v16  ;;  %v957_v33 = vmax.f32 %v955_v61, %v956_v22  ;;  %v971_v34 = vmax.f32 %v969_v62, %v970_v23 }
 0x274   :  { %v964_v21 = vmax.f32 %v962_v8, %v963_v26  ;;  %v978_v1 = vmax.f32 %v976_v9, %v977_v27  ;;  %v1016_v19 = vmax.f32 %v938_v10, %v946_v30  ;;  %v1030_v32 = vmax.f32 %v940_v11, %v948_v31 }
 0x275   :  { %v1010_v13 = vrot.slane %v1009_v28, 4  ;;  %v1024_v15 = vrot.slane %v1023_v29, 4  ;;  %v1088_v39 = vunpack.c.l.s4 %v1505_v38  ;;  %v958_v45 = vrot.slane %v957_v33, 1 }
 0x276   :  { %v1017_v24 = vrot.slane %v1016_v19, 4  ;;  %v1031_v25 = vrot.slane %v1030_v32, 4  ;;  %v965_v37 = vrot.slane %v964_v21, 1  ;;  %v979_v40 = vrot.slane %v978_v1, 1 }
 0x277   :  { %v1011_v35 = vmax.f32 %v1009_v28, %v1010_v13  ;;  %v1025_v36 = vmax.f32 %v1023_v29, %v1024_v15  ;;  %v972_v46 = vrot.slane %v971_v34, 1  ;;  %v367_v47 = vsub.s32 4, %v1809_v12 }
 0x278   :  { %v1018_v43 = vmax.f32 %v1016_v19, %v1017_v24  ;;  %v1032_v44 = vmax.f32 %v1030_v32, %v1031_v25  ;;  %v375_v48 = vsub.s32 6, %v1809_v12  ;;  %v966_v53 = vmax.f32 %v964_v21, %v965_v37 }
 0x279   :  { %v1012_v41 = vrot.slane %v1011_v35, 2  ;;  %v1026_v42 = vrot.slane %v1025_v36, 2  ;;  %v1089_v54 = vunpack.c.0.s8 %v1088_v39  ;;  %v980_v55 = vmax.f32 %v978_v1, %v979_v40 }
 0x27a   :  { %v1019_v51 = vrot.slane %v1018_v43, 2  ;;  %v1033_v52 = vrot.slane %v1032_v44, 2  ;;  %v371_v56 = vsub.s32 5, %v1809_v12  ;;  %v959_v61 = vmax.f32 %v957_v33, %v958_v45 }
 0x27b   :  { %v1013_v49 = vmax.f32 %v1011_v35, %v1012_v41  ;;  %v1027_v50 = vmax.f32 %v1025_v36, %v1026_v42  ;;  %v973_v62 = vmax.f32 %v971_v34, %v972_v46  ;;  %v379_v63 = vsub.s32 7, %v1809_v12 }
 0x27c   :  { %v1020_v59 = vmax.f32 %v1018_v43, %v1019_v51  ;;  %v1034_v60 = vmax.f32 %v1032_v44, %v1033_v52  ;;  %v1826_v3 = vrot.slane %v1813_v17, %v367_v47  ;;  %v1829_v4 = vrot.slane %v1813_v17, %v375_v48 }
 0x27d   :  { %v1014_v57 = vrot.slane %v1013_v49, 1  ;;  %v1028_v58 = vrot.slane %v1027_v50, 1  ;;  %v1085_v5 = vcombine.low %v959_v61, %v966_v53  ;;  %v1832_v6 = vsub.s32 %v1089_v54, %v1809_v12 }
 0x27e   :  { %v1021_v0 = vrot.slane %v1020_v59, 1  ;;  %v1035_v2 = vrot.slane %v1034_v60, 1  ;;  %v1086_v7 = vcombine.low %v973_v62, %v980_v55  ;;  %v1835_v8 = vrot.slane %v1813_v17, %v371_v56 }
 0x27f   :  { %v1015_v9 = vmax.f32 %v1013_v49, %v1014_v57  ;;  %v1029_v10 = vmax.f32 %v1027_v50, %v1028_v58  ;;  %v1838_v20 = vrot.slane %v1813_v17, %v379_v63  ;;  %v1093_v29 = vrot.slane %v1085_v5, %v1832_v6 }
 0x280   :  { %v1022_v11 = vmax.f32 %v1020_v59, %v1021_v0  ;;  %v1036_v14 = vmax.f32 %v1034_v60, %v1035_v2  ;;  %v1100_v30 = vrot.slane %v1086_v7, %v1832_v6 }
 0x281   :  { %v849_v16 = vpop.f32.mrf.mxu1  ;;  %v902_v18 = vpop.f32.mrf.mxu0 }
 0x282   :  { %v1119_v22 = vcombine.low %v1015_v9, %v1022_v11  ;;  %v1120_v23 = vcombine.low %v1029_v10, %v1036_v14  ;;  %v850_v26 = vadd.f32 %v849_v16, %v1826_v3  ;;  %v903_v12 = vadd.f32 %v902_v18, %v1829_v4 }
 0x283   :  { %v851_v27 = vpop.f32.mrf.mxu1  ;;  %v904_v28 = vpop.f32.mrf.mxu0  ;;  %v1101_v40 = vcombine.low %v1093_v29, %v1100_v30 }
 0x284   :  { %v1127_v31 = vrot.slane %v1119_v22, %v1832_v6  ;;  %v1134_v21 = vrot.slane %v1120_v23, %v1832_v6  ;;  %v852_v1 = vadd.f32 %v851_v27, %v1835_v8  ;;  %v925_v33 = vmax.f32 %v850_v26, 0.0 }
 0x285   :  { %v853_v17 = vpop.f32.mrf.mxu1  ;;  %v906_v13 = vpop.f32.mrf.mxu0  ;;  %v927_v34 = vmax.f32 %v903_v12, 0.0  ;;  %v905_v35 = vadd.f32 %v904_v28, %v1838_v20 }
 0x286   :  { %v854_v15 = vadd.f32 %v853_v17, %v1826_v3  ;;  %v907_v19 = vadd.f32 %v906_v13, %v1829_v4  ;;  %v1135_v32 = vcombine.low %v1127_v31, %v1134_v21  ;;  %v926_v42 = vmax.f32 %v852_v1, 0.0 }
 0x287   :  { %v855_v36 = vpop.f32.mrf.mxu1  ;;  %v908_v24 = vpop.f32.mrf.mxu0  ;;  %v928_v50 = vmax.f32 %v905_v35, 0.0 }
 0x288   :  { %v933_v25 = vmax.f32 %v854_v15, 0.0  ;;  %v935_v37 = vmax.f32 %v907_v19, 0.0  ;;  %v856_v38 = vadd.f32 %v855_v36, %v1835_v8  ;;  %v909_v39 = vadd.f32 %v908_v24, %v1838_v20 }
 0x289   :  { %v1157_v41 = vrot.slane %v1135_v32, 7  ;;  %v859_v43 = vpop.f32.mrf.mxu1  ;;  %v912_v44 = vpop.f32.mrf.mxu0 }
 0x28a   :  { %v981_v45 = vmax.f32 %v925_v33, %v933_v25  ;;  %v995_v46 = vmax.f32 %v927_v34, %v935_v37  ;;  %v934_v47 = vmax.f32 %v856_v38, 0.0  ;;  %v936_v48 = vmax.f32 %v909_v39, 0.0 }
 0x28b   :  { %v1159_v49 = vsel %vm1158_vm1, %v1157_v41, %v1101_v40  ;;  %v861_v51 = vpop.f32.mrf.mxu1  ;;  %v914_v52 = vpop.f32.mrf.mxu0  ;;  %v860_v59 = vadd.f32 %v859_v43, %v1826_v3  ;;  %v913_v0 = vadd.f32 %v912_v44, %v1829_v4 }
 0x28c   :  { %v1161_v53 = vsel %vm1160_vm2, %v1157_v41, %v1159_v49  ;;  %v982_v54 = vrot.slane %v981_v45, 4  ;;  %v996_v55 = vrot.slane %v995_v46, 4  ;;  %v988_v56 = vmax.f32 %v926_v42, %v934_v47 }
 0x28d   :  { %v1163_v57 = vsel %vm1162_vm3, %v1157_v41, %v1161_v53  ;;  %v1002_v58 = vmax.f32 %v928_v50, %v936_v48  ;;  %v863_v60 = vpop.f32.mrf.mxu1  ;;  %v916_v61 = vpop.f32.mrf.mxu0  ;;  %v862_v11 = vadd.f32 %v861_v51, %v1835_v8  ;;  %v941_v23 = vmax.f32 %v860_v59, 0.0 }
 0x28e   :  { %v1165_v62 = vsel %vm1164_vm4, %v1157_v41, %v1163_v57  ;;  %v989_v63 = vrot.slane %v988_v56, 4  ;;  %v983_v2 = vmax.f32 %v981_v45, %v982_v54  ;;  %v864_v7 = vadd.f32 %v863_v60, %v1826_v3 }
 0x28f   :  { %1175 = vst [vmem:[%s1885_s7] sm:$0xff] %v1165_v62  ;;  %v1003_v5 = vrot.slane %v1002_v58, 4  ;;  %v997_v9 = vmax.f32 %v995_v46, %v996_v55  ;;  %v917_v14 = vadd.f32 %v916_v61, %v1829_v4  ;;  %v865_v16 = vpop.f32.mrf.mxu1  ;;  %v918_v18 = vpop.f32.mrf.mxu0  ;;  %v915_v26 = vadd.f32 %v914_v52, %v1838_v20 }
 0x290   :  { %v990_v10 = vmax.f32 %v988_v56, %v989_v63  ;;  %v949_v12 = vmax.f32 %v864_v7, 0.0  ;;  %v943_v28 = vmax.f32 %v913_v0, 0.0  ;;  %v866_v3 = vadd.f32 %v865_v16, %v1835_v8 }
 0x291   :  { %v1004_v22 = vmax.f32 %v1002_v58, %v1003_v5  ;;  %v951_v29 = vmax.f32 %v917_v14, 0.0  ;;  %v919_v21 = vadd.f32 %v918_v18, %v1838_v20  ;;  %v984_v1 = vrot.slane %v983_v2, 2 }
 0x292   :  { %v991_v27 = vrot.slane %v990_v10, 2  ;;  %v1037_v31 = vmax.f32 %v941_v23, %v949_v12  ;;  %v998_v17 = vrot.slane %v997_v9, 2  ;;  %v942_v13 = vmax.f32 %v862_v11, 0.0 }
 0x293   :  { %v1005_v30 = vrot.slane %v1004_v22, 2  ;;  %v1051_v4 = vmax.f32 %v943_v28, %v951_v29  ;;  %v944_v15 = vmax.f32 %v915_v26, 0.0  ;;  %v950_v32 = vmax.f32 %v866_v3, 0.0 }
 0x294   :  { %v1038_v19 = vrot.slane %v1037_v31, 4  ;;  %v952_v33 = vmax.f32 %v919_v21, 0.0  ;;  %v992_v34 = vmax.f32 %v990_v10, %v991_v27  ;;  %v985_v38 = vmax.f32 %v983_v2, %v984_v1 }
 0x295   :  { %v1006_v35 = vmax.f32 %v1004_v22, %v1005_v30  ;;  %v1052_v36 = vrot.slane %v1051_v4, 4  ;;  %v1044_v25 = vmax.f32 %v942_v13, %v950_v32  ;;  %v999_v39 = vmax.f32 %v997_v9, %v998_v17 }
 0x296   :  { %v1039_v24 = vmax.f32 %v1037_v31, %v1038_v19  ;;  %v1058_v37 = vmax.f32 %v944_v15, %v952_v33  ;;  %v993_v42 = vrot.slane %v992_v34, 1  ;;  %v986_v48 = vrot.slane %v985_v38, 1 }
 0x297   :  { %v1053_v40 = vmax.f32 %v1051_v4, %v1052_v36  ;;  %v1045_v41 = vrot.slane %v1044_v25, 4  ;;  %v1007_v43 = vrot.slane %v1006_v35, 1  ;;  %v1000_v49 = vrot.slane %v999_v39, 1 }
 0x298   :  { %v1040_v8 = vrot.slane %v1039_v24, 2  ;;  %v1059_v20 = vrot.slane %v1058_v37, 4  ;;  %v994_v53 = vmax.f32 %v992_v34, %v993_v42  ;;  %v987_v59 = vmax.f32 %v985_v38, %v986_v48 }
 0x299   :  { %v1054_v44 = vrot.slane %v1053_v40, 2  ;;  %v1046_v46 = vmax.f32 %v1044_v25, %v1045_v41  ;;  %v1008_v54 = vmax.f32 %v1006_v35, %v1007_v43  ;;  %v1001_v60 = vmax.f32 %v999_v39, %v1000_v49 }
 0x29a   :  { %v1041_v45 = vmax.f32 %v1039_v24, %v1040_v8  ;;  %v1060_v47 = vmax.f32 %v1058_v37, %v1059_v20  ;;  %v1102_v63 = vcombine.low %v987_v59, %v994_v53 }
 0x29b   :  { %v1055_v50 = vmax.f32 %v1053_v40, %v1054_v44  ;;  %v1047_v51 = vrot.slane %v1046_v46, 2  ;;  %v1103_v0 = vcombine.low %v1001_v60, %v1008_v54 }
 0x29c   :  { %v1061_v52 = vrot.slane %v1060_v47, 2  ;;  %v1042_v55 = vrot.slane %v1041_v45, 1  ;;  %v1110_v14 = vrot.slane %v1102_v63, %v1832_v6 }
 0x29d   :  { %v1056_v56 = vrot.slane %v1055_v50, 1  ;;  %v1048_v57 = vmax.f32 %v1046_v46, %v1047_v51  ;;  %v1117_v16 = vrot.slane %v1103_v0, %v1832_v6 }
 0x29e   :  { %v1062_v58 = vmax.f32 %v1060_v47, %v1061_v52  ;;  %v1043_v2 = vmax.f32 %v1041_v45, %v1042_v55 }
 0x29f   :  { %v1049_v61 = vrot.slane %v1048_v57, 1  ;;  %v1057_v5 = vmax.f32 %v1055_v50, %v1056_v56  ;;  %v1118_v26 = vcombine.low %v1110_v14, %v1117_v16 }
 0x2a0   :  { %v1063_v62 = vrot.slane %v1062_v58, 1 }
 0x2a1   :  { %v1050_v7 = vmax.f32 %v1048_v57, %v1049_v61 }
 0x2a2   :  { %v1064_v9 = vmax.f32 %v1062_v58, %v1063_v62 }
 0x2a3   :  { %v1136_v10 = vcombine.low %v1043_v2, %v1050_v7 }
 0x2a4   :  { %v1137_v11 = vcombine.low %v1057_v5, %v1064_v9 }
 0x2a5   :  { %v1144_v18 = vrot.slane %v1136_v10, %v1832_v6 }
 0x2a6   :  { %v1151_v22 = vrot.slane %v1137_v11, %v1832_v6 }
 0x2a8   :  { %v1152_v23 = vcombine.low %v1144_v18, %v1151_v22 }
 0x2aa   :  { %v1168_v12 = vrot.slane %v1152_v23, 7 }
 0x2ac   :  { %v1169_v27 = vsel %vm1158_vm1, %v1168_v12, %v1118_v26 }
 0x2ad   :  { %v1170_v28 = vsel %vm1160_vm2, %v1168_v12, %v1169_v27 }
 0x2ae   :  { %v1171_v29 = vsel %vm1162_vm3, %v1168_v12, %v1170_v28 }
 0x2af   :  { %v1172_v30 = vsel %vm1164_vm4, %v1168_v12, %v1171_v29 }
 0x2b0   :  { %1176 = vst [vmem:[%s1885_s7 + $0x8] sm:$0xff] %v1172_v30 }
 0x2b1   :  { %1297 = vsyncpa [#allocation3], 1 }
 0x2b2   :  { %1298 = vsyncpa [#allocation5], 1 }
 0x2b3   :  { %1299 = vsyncpa [#allocation8], 1 }

// kernel: stn3d_forward.3
= control target key start
LH: loop header
LB: loop body
LE: loop exit
PB: predicated region body
PF: predicated region fallthrough
CT: control target
= control target key end

     0   :  { %v3495_v36 = vmov 1983009808   ;;  %v35_v38 = vlaneseq  ;;  %s4639_s1 = inlined_call_operand.vmem [shape: bf16[1024,512], index: 1, kind: input, shape index: {}]   ;;  %s4640_s0 = inlined_call_operand.vmem [shape: f32[2,1024], index: 0, kind: input, shape index: {}]   ;;  %s4641_s3 = inlined_call_operand.vmem [shape: bf16[512,256], index: 3, kind: input, shape index: {}]   ;;  %s4642_s2 = inlined_call_operand.vmem [shape: f32[1,512], index: 2, kind: input, shape index: {}]   ;;  %s4643_s5 = inlined_call_operand.vmem [shape: bf16[256,128], index: 5, kind: input, shape index: {}]   ;;  %s4644_s4 = inlined_call_operand.vmem [shape: f32[1,256], index: 4, kind: input, shape index: {}]   ;;  %s4645_s6 = inlined_call_operand.vmem [shape: f32[1,128], index: 6, kind: input, shape index: {}]   ;;  %s4646_s7 = inlined_call_operand.vmem [shape: f32[2,128], index: 7, kind: output, shape index: {}]  }
   0x1   :  { %v2997_v0 = vld [vmem:[%s4639_s1 + $0xe4] ss:$16 sps:$4 sm:$0xff]   ;;  %v3001_v2 = vld [vmem:[%s4639_s1 + $0xe0] ss:$16 sps:$4 sm:$0xff]   ;;  %v33_v37 = vunpack.c.l.s4 %v3495_v36 }
   0x2   :  { %v2999_v1 = vld [vmem:[%s4639_s1 + $0x2e4] ss:$16 sps:$4 sm:$0xff]   ;;  %1639 = vmatprep.subr.bf16.mxu0 %v2997_v0  ;;  %v3002_v3 = vld [vmem:[%s4639_s1 + $0x2e0] ss:$16 sps:$4 sm:$0xff]   ;;  %v3653_v43 = vshrl.u32 %v35_v38, 7 }
   0x3   :  { %1680 = vmatprep.subr.bf16.mxu1 %v2999_v1  ;;  %v3003_v4 = vld [vmem:[%s4639_s1 + $0xc4] ss:$16 sps:$4 sm:$0xff]   ;;  %1640 = vmatpush1.bf16.msra.mxu0 %v3001_v2  ;;  %v3007_v6 = vld [vmem:[%s4639_s1 + $0xc0] ss:$16 sps:$4 sm:$0xff]   ;;  %v34_v42 = vunpack.c.0.s8 %v33_v37 }
   0x4   :  { %1681 = vmatpush1.bf16.msra.mxu1 %v3002_v3  ;;  %v3005_v5 = vld [vmem:[%s4639_s1 + $0x2c4] ss:$16 sps:$4 sm:$0xff]   ;;  %1641 = vmatprep.subr.bf16.mxu0 %v3003_v4  ;;  %v3008_v7 = vld [vmem:[%s4639_s1 + $0x2c0] ss:$16 sps:$4 sm:$0xff]   ;;  %v28_v4 = vld [vmem:[%s4640_s0 + $0x8] sm:$0xff] }
   0x5   :  { %1682 = vmatprep.subr.bf16.mxu1 %v3005_v5  ;;  %v3009_v8 = vld [vmem:[%s4639_s1 + $0xa4] ss:$16 sps:$4 sm:$0xff]   ;;  %v3013_v10 = vld [vmem:[%s4639_s1 + $0xa0] ss:$16 sps:$4 sm:$0xff]   ;;  %v37_v49 = vsub.s32 %v34_v42, %v3653_v43 }
   0x6   :  { %v3011_v9 = vld [vmem:[%s4639_s1 + $0x2a4] ss:$16 sps:$4 sm:$0xff]   ;;  %v3014_v11 = vld [vmem:[%s4639_s1 + $0x2a0] ss:$16 sps:$4 sm:$0xff]  }
   0x7   :  { %1642 = vmatpush1.bf16.msra.mxu0 %v3007_v6  ;;  %v3015_v12 = vld [vmem:[%s4639_s1 + $0x84] ss:$16 sps:$4 sm:$0xff]   ;;  %v3019_v14 = vld [vmem:[%s4639_s1 + $0x80] ss:$16 sps:$4 sm:$0xff]  }
   0x8   :  { %1683 = vmatpush1.bf16.msra.mxu1 %v3008_v7  ;;  %1643 = vmatprep.subr.bf16.mxu0 %v3009_v8  ;;  %v3017_v13 = vld [vmem:[%s4639_s1 + $0x284] ss:$16 sps:$4 sm:$0xff]   ;;  %v3020_v15 = vld [vmem:[%s4639_s1 + $0x280] ss:$16 sps:$4 sm:$0xff]  }
   0x9   :  { %1684 = vmatprep.subr.bf16.mxu1 %v3011_v9  ;;  %v3021_v16 = vld [vmem:[%s4639_s1 + $0x64] ss:$16 sps:$4 sm:$0xff]   ;;  %v3025_v18 = vld [vmem:[%s4639_s1 + $0x60] ss:$16 sps:$4 sm:$0xff]   ;;  %v48_v9 = vcombine.high %v28_v4, %v28_v4 }
   0xa   :  { %v3023_v17 = vld [vmem:[%s4639_s1 + $0x264] ss:$16 sps:$4 sm:$0xff]   ;;  %v3026_v19 = vld [vmem:[%s4639_s1 + $0x260] ss:$16 sps:$4 sm:$0xff]  }
   0xb   :  { %1644 = vmatpush1.bf16.msra.mxu0 %v3013_v10  ;;  %v3027_v20 = vld [vmem:[%s4639_s1 + $0x44] ss:$16 sps:$4 sm:$0xff]   ;;  %v3031_v22 = vld [vmem:[%s4639_s1 + $0x40] ss:$16 sps:$4 sm:$0xff]  }
   0xc   :  { %1685 = vmatpush1.bf16.msra.mxu1 %v3014_v11  ;;  %1645 = vmatprep.subr.bf16.mxu0 %v3015_v12  ;;  %v3029_v21 = vld [vmem:[%s4639_s1 + $0x244] ss:$16 sps:$4 sm:$0xff]   ;;  %v3032_v23 = vld [vmem:[%s4639_s1 + $0x240] ss:$16 sps:$4 sm:$0xff]  }
   0xd   :  { %1686 = vmatprep.subr.bf16.mxu1 %v3017_v13  ;;  %v3033_v24 = vld [vmem:[%s4639_s1 + $0x24] ss:$16 sps:$4 sm:$0xff]   ;;  %v3037_v26 = vld [vmem:[%s4639_s1 + $0x20] ss:$16 sps:$4 sm:$0xff]  }
   0xe   :  { %v3035_v25 = vld [vmem:[%s4639_s1 + $0x224] ss:$16 sps:$4 sm:$0xff]   ;;  %v3038_v27 = vld [vmem:[%s4639_s1 + $0x220] ss:$16 sps:$4 sm:$0xff]  }
   0xf   :  { %1646 = vmatpush1.bf16.msra.mxu0 %v3019_v14  ;;  %v3039_v28 = vld [vmem:[%s4639_s1 + $0x4] ss:$16 sps:$4 sm:$0xff]   ;;  %v3043_v30 = vld [vmem:[%s4639_s1] ss:$16 sps:$4 sm:$0xff]   ;;  %v3737_v14 = vrot.slane %v28_v4, %v37_v49 }
  0x10   :  { %1687 = vmatpush1.bf16.msra.mxu1 %v3020_v15  ;;  %1647 = vmatprep.subr.bf16.mxu0 %v3021_v16  ;;  %v3041_v29 = vld [vmem:[%s4639_s1 + $0x204] ss:$16 sps:$4 sm:$0xff]   ;;  %v3044_v31 = vld [vmem:[%s4639_s1 + $0x200] ss:$16 sps:$4 sm:$0xff]   ;;  %v3739_v15 = vrot.slane %v48_v9, %v37_v49 }
  0x11   :  { %1688 = vmatprep.subr.bf16.mxu1 %v3023_v17  ;;  %v3045_v32 = vld [vmem:[%s4639_s1 + $0x1e4] ss:$16 sps:$4 sm:$0xff]   ;;  %v3049_v34 = vld [vmem:[%s4639_s1 + $0x1e0] ss:$16 sps:$4 sm:$0xff]  }
  0x12   :  { %v3047_v33 = vld [vmem:[%s4639_s1 + $0x3e4] ss:$16 sps:$4 sm:$0xff]   ;;  %v3050_v35 = vld [vmem:[%s4639_s1 + $0x3e0] ss:$16 sps:$4 sm:$0xff]  }
  0x13   :  { %1648 = vmatpush1.bf16.msra.mxu0 %v3025_v18  ;;  %v3051_v39 = vld [vmem:[%s4639_s1 + $0x1c4] ss:$16 sps:$4 sm:$0xff]   ;;  %v3055_v41 = vld [vmem:[%s4639_s1 + $0x1c0] ss:$16 sps:$4 sm:$0xff]  }
  0x14   :  { %1689 = vmatpush1.bf16.msra.mxu1 %v3026_v19  ;;  %1649 = vmatprep.subr.bf16.mxu0 %v3027_v20  ;;  %v3053_v40 = vld [vmem:[%s4639_s1 + $0x3c4] ss:$16 sps:$4 sm:$0xff]   ;;  %v3056_v44 = vld [vmem:[%s4639_s1 + $0x3c0] ss:$16 sps:$4 sm:$0xff]   ;;  %v63_v20 = vcombine.high %v3737_v14, %v3737_v14 }
  0x15   :  { %1690 = vmatprep.subr.bf16.mxu1 %v3029_v21  ;;  %v3057_v45 = vld [vmem:[%s4639_s1 + $0x1a4] ss:$16 sps:$4 sm:$0xff]   ;;  %v3061_v47 = vld [vmem:[%s4639_s1 + $0x1a0] ss:$16 sps:$4 sm:$0xff]   ;;  %v64_v21 = vcombine.high %v3739_v15, %v3739_v15 }
  0x16   :  { %v3059_v46 = vld [vmem:[%s4639_s1 + $0x3a4] ss:$16 sps:$4 sm:$0xff]   ;;  %v3062_v48 = vld [vmem:[%s4639_s1 + $0x3a0] ss:$16 sps:$4 sm:$0xff]  }
  0x17   :  { %1650 = vmatpush1.bf16.msra.mxu0 %v3031_v22  ;;  %v3063_v50 = vld [vmem:[%s4639_s1 + $0x184] ss:$16 sps:$4 sm:$0xff]   ;;  %v3067_v55 = vld [vmem:[%s4639_s1 + $0x180] ss:$16 sps:$4 sm:$0xff]  }
  0x18   :  { %1691 = vmatpush1.bf16.msra.mxu1 %v3032_v23  ;;  %1651 = vmatprep.subr.bf16.mxu0 %v3033_v24  ;;  %v3065_v51 = vld [vmem:[%s4639_s1 + $0x384] ss:$16 sps:$4 sm:$0xff]   ;;  %v3068_v56 = vld [vmem:[%s4639_s1 + $0x380] ss:$16 sps:$4 sm:$0xff]  }
  0x19   :  { %1692 = vmatprep.subr.bf16.mxu1 %v3035_v25  ;;  %v27_v52 = vld [vmem:[%s4640_s0] sm:$0xff] }
  0x1a   :  { %v38_v53 = vrot.slane %v27_v52, %v37_v49  ;;  %v31_v54 = vcombine.high %v27_v52, %v27_v52  ;;  %v3069_v57 = vld [vmem:[%s4639_s1 + $0x164] ss:$16 sps:$4 sm:$0xff]   ;;  %v3073_v63 = vld [vmem:[%s4639_s1 + $0x160] ss:$16 sps:$4 sm:$0xff]  }
  0x1b   :  { %1652 = vmatpush1.bf16.msra.mxu0 %v3037_v26  ;;  %v3071_v58 = vld [vmem:[%s4639_s1 + $0x364] ss:$16 sps:$4 sm:$0xff]   ;;  %v3074_v0 = vld [vmem:[%s4639_s1 + $0x360] ss:$16 sps:$4 sm:$0xff]  }
  0x1c   :  { %1693 = vmatpush1.bf16.msra.mxu1 %v3038_v27  ;;  %1653 = vmatprep.subr.bf16.mxu0 %v3039_v28  ;;  %v46_v59 = vcombine.high %v38_v53, %v38_v53  ;;  %v45_v60 = vrot.slane %v31_v54, %v37_v49  ;;  %v3075_v1 = vld [vmem:[%s4639_s1 + $0x144] ss:$16 sps:$4 sm:$0xff]   ;;  %v3079_v5 = vld [vmem:[%s4639_s1 + $0x140] ss:$16 sps:$4 sm:$0xff]   ;;  %v3757_v22 = vpack.c.bf16 %v38_v53, %v38_v53 }
  0x1d   :  { %1694 = vmatprep.subr.bf16.mxu1 %v3041_v29  ;;  %v3077_v2 = vld [vmem:[%s4639_s1 + $0x344] ss:$16 sps:$4 sm:$0xff]   ;;  %v3080_v6 = vld [vmem:[%s4639_s1 + $0x340] ss:$16 sps:$4 sm:$0xff]   ;;  %v3773_v28 = vpack.c.bf16 %v63_v20, %v63_v20  ;;  %v3775_v29 = vpack.c.bf16 %v64_v21, %v64_v21 }
  0x1e   :  { %v3692_v61 = vpack.c.bf16 %v46_v59, %v46_v59  ;;  %v47_v62 = vcombine.high %v45_v60, %v45_v60  ;;  %v3081_v7 = vld [vmem:[%s4639_s1 + $0x124] ss:$16 sps:$4 sm:$0xff]   ;;  %v3085_v10 = vld [vmem:[%s4639_s1 + $0x120] ss:$16 sps:$4 sm:$0xff]   ;;  %v3759_v23 = vpack.c.bf16 %v45_v60, %v45_v60 }
  0x1f   :  { %1654 = vmatpush1.bf16.msra.mxu0 %v3043_v30  ;;  %v3083_v8 = vld [vmem:[%s4639_s1 + $0x324] ss:$16 sps:$4 sm:$0xff]   ;;  %v3086_v11 = vld [vmem:[%s4639_s1 + $0x320] ss:$16 sps:$4 sm:$0xff]  }
  0x20   :  { %1695 = vmatpush1.bf16.msra.mxu1 %v3044_v31  ;;  %1655 = vmatprep.subr.bf16.mxu0 %v3045_v32  ;;  %v3706_v3 = vpack.c.bf16 %v47_v62, %v47_v62  ;;  %v3087_v12 = vld [vmem:[%s4639_s1 + $0x104] ss:$16 sps:$4 sm:$0xff]   ;;  %v3091_v16 = vld [vmem:[%s4639_s1 + $0x100] ss:$16 sps:$4 sm:$0xff]  }
  0x21   :  { %1696 = vmatprep.subr.bf16.mxu1 %v3047_v33  ;;  %1671 = vmatprep.mubr.bf16.mxu0 %v3692_v61  ;;  %v3089_v13 = vld [vmem:[%s4639_s1 + $0x304] ss:$16 sps:$4 sm:$0xff]   ;;  %v3092_v17 = vld [vmem:[%s4639_s1 + $0x300] ss:$16 sps:$4 sm:$0xff]  }
  0x22   :  { %1712 = vmatprep.mubr.bf16.mxu1 %v3706_v3  ;;  %v3097_v18 = vld [vmem:[%s4639_s1 + $0x4e4] ss:$16 sps:$4 sm:$0xff]   ;;  %v3095_v24 = vld [vmem:[%s4639_s1 + $0x4e0] ss:$16 sps:$4 sm:$0xff]  }
  0x23   :  { %1656 = vmatpush2.bf16.msra.mxu0 %v3049_v34  ;;  %v3100_v19 = vld [vmem:[%s4639_s1 + $0x6e4] ss:$16 sps:$4 sm:$0xff]   ;;  %v3098_v25 = vld [vmem:[%s4639_s1 + $0x6e0] ss:$16 sps:$4 sm:$0xff]  }
  0x24   :  { %1697 = vmatpush2.bf16.msra.mxu1 %v3050_v35  ;;  %1657 = vmatprep.subr.bf16.mxu0 %v3051_v39  ;;  %v3103_v26 = vld [vmem:[%s4639_s1 + $0x4c4] ss:$16 sps:$4 sm:$0xff]   ;;  %v3101_v30 = vld [vmem:[%s4639_s1 + $0x4c0] ss:$16 sps:$4 sm:$0xff]  }
  0x25   :  { %1698 = vmatprep.subr.bf16.mxu1 %v3053_v40  ;;  %v3106_v27 = vld [vmem:[%s4639_s1 + $0x6c4] ss:$16 sps:$4 sm:$0xff]   ;;  %v3104_v31 = vld [vmem:[%s4639_s1 + $0x6c0] ss:$16 sps:$4 sm:$0xff]  }
  0x26   :  { %v3109_v32 = vld [vmem:[%s4639_s1 + $0x4a4] ss:$16 sps:$4 sm:$0xff]   ;;  %v3107_v34 = vld [vmem:[%s4639_s1 + $0x4a0] ss:$16 sps:$4 sm:$0xff]  }
  0x27   :  { %1658 = vmatpush2.bf16.msra.mxu0 %v3055_v41  ;;  %v3112_v33 = vld [vmem:[%s4639_s1 + $0x6a4] ss:$16 sps:$4 sm:$0xff]   ;;  %v3110_v35 = vld [vmem:[%s4639_s1 + $0x6a0] ss:$16 sps:$4 sm:$0xff]  }
  0x28   :  { %1699 = vmatpush2.bf16.msra.mxu1 %v3056_v44  ;;  %1659 = vmatprep.subr.bf16.mxu0 %v3057_v45  ;;  %v3115_v36 = vld [vmem:[%s4639_s1 + $0x484] ss:$16 sps:$4 sm:$0xff]   ;;  %v3113_v38 = vld [vmem:[%s4639_s1 + $0x480] ss:$16 sps:$4 sm:$0xff]  }
  0x29   :  { %1700 = vmatprep.subr.bf16.mxu1 %v3059_v46  ;;  %v3118_v37 = vld [vmem:[%s4639_s1 + $0x684] ss:$16 sps:$4 sm:$0xff]   ;;  %v3116_v39 = vld [vmem:[%s4639_s1 + $0x680] ss:$16 sps:$4 sm:$0xff]  }
  0x2a   :  { %v3121_v40 = vld [vmem:[%s4639_s1 + $0x464] ss:$16 sps:$4 sm:$0xff]   ;;  %v3119_v42 = vld [vmem:[%s4639_s1 + $0x460] ss:$16 sps:$4 sm:$0xff]  }
  0x2b   :  { %1660 = vmatpush2.bf16.msra.mxu0 %v3061_v47  ;;  %v3124_v41 = vld [vmem:[%s4639_s1 + $0x664] ss:$16 sps:$4 sm:$0xff]   ;;  %v3122_v44 = vld [vmem:[%s4639_s1 + $0x660] ss:$16 sps:$4 sm:$0xff]  }
  0x2c   :  { %1701 = vmatpush2.bf16.msra.mxu1 %v3062_v48  ;;  %1661 = vmatprep.subr.bf16.mxu0 %v3063_v50  ;;  %v3127_v45 = vld [vmem:[%s4639_s1 + $0x444] ss:$16 sps:$4 sm:$0xff]   ;;  %v3125_v47 = vld [vmem:[%s4639_s1 + $0x440] ss:$16 sps:$4 sm:$0xff]  }
  0x2d   :  { %1702 = vmatprep.subr.bf16.mxu1 %v3065_v51  ;;  %v3130_v46 = vld [vmem:[%s4639_s1 + $0x644] ss:$16 sps:$4 sm:$0xff]   ;;  %v3128_v48 = vld [vmem:[%s4639_s1 + $0x640] ss:$16 sps:$4 sm:$0xff]  }
  0x2e   :  { %v3133_v49 = vld [vmem:[%s4639_s1 + $0x424] ss:$16 sps:$4 sm:$0xff]   ;;  %v3131_v51 = vld [vmem:[%s4639_s1 + $0x420] ss:$16 sps:$4 sm:$0xff]  }
  0x2f   :  { %1662 = vmatpush2.bf16.msra.mxu0 %v3067_v55  ;;  %v3136_v50 = vld [vmem:[%s4639_s1 + $0x624] ss:$16 sps:$4 sm:$0xff]   ;;  %v3134_v52 = vld [vmem:[%s4639_s1 + $0x620] ss:$16 sps:$4 sm:$0xff]  }
  0x30   :  { %1703 = vmatpush2.bf16.msra.mxu1 %v3068_v56  ;;  %1663 = vmatprep.subr.bf16.mxu0 %v3069_v57  ;;  %v3139_v53 = vld [vmem:[%s4639_s1 + $0x404] ss:$16 sps:$4 sm:$0xff]   ;;  %v3137_v55 = vld [vmem:[%s4639_s1 + $0x400] ss:$16 sps:$4 sm:$0xff]  }
  0x31   :  { %1704 = vmatprep.subr.bf16.mxu1 %v3071_v58  ;;  %v3142_v54 = vld [vmem:[%s4639_s1 + $0x604] ss:$16 sps:$4 sm:$0xff]   ;;  %v3140_v56 = vld [vmem:[%s4639_s1 + $0x600] ss:$16 sps:$4 sm:$0xff]  }
  0x32   :  { %v3145_v57 = vld [vmem:[%s4639_s1 + $0x5e4] ss:$16 sps:$4 sm:$0xff]   ;;  %v3143_v59 = vld [vmem:[%s4639_s1 + $0x5e0] ss:$16 sps:$4 sm:$0xff]  }
  0x33   :  { %1664 = vmatpush2.bf16.msra.mxu0 %v3073_v63  ;;  %v3148_v58 = vld [vmem:[%s4639_s1 + $0x7e4] ss:$16 sps:$4 sm:$0xff]   ;;  %v3146_v60 = vld [vmem:[%s4639_s1 + $0x7e0] ss:$16 sps:$4 sm:$0xff]  }
  0x34   :  { %1705 = vmatpush2.bf16.msra.mxu1 %v3074_v0  ;;  %1665 = vmatprep.subr.bf16.mxu0 %v3075_v1  ;;  %v3151_v62 = vld [vmem:[%s4639_s1 + $0x5c4] ss:$16 sps:$4 sm:$0xff]   ;;  %v3149_v0 = vld [vmem:[%s4639_s1 + $0x5c0] ss:$16 sps:$4 sm:$0xff]  }
  0x35   :  { %1706 = vmatprep.subr.bf16.mxu1 %v3077_v2  ;;  %v3154_v63 = vld [vmem:[%s4639_s1 + $0x7c4] ss:$16 sps:$4 sm:$0xff]   ;;  %v3152_v1 = vld [vmem:[%s4639_s1 + $0x7c0] ss:$16 sps:$4 sm:$0xff]  }
  0x36   :  { %v3157_v2 = vld [vmem:[%s4639_s1 + $0x5a4] ss:$16 sps:$4 sm:$0xff]   ;;  %v3161_v9 = vld [vmem:[%s4639_s1 + $0x580] ss:$16 sps:$4 sm:$0xff]  }
  0x37   :  { %1666 = vmatpush2.bf16.msra.mxu0 %v3079_v5  ;;  %v3160_v4 = vld [vmem:[%s4639_s1 + $0x7a4] ss:$16 sps:$4 sm:$0xff]   ;;  %v3155_v5 = vld [vmem:[%s4639_s1 + $0x5a0] ss:$16 sps:$4 sm:$0xff]  }
  0x38   :  { %1707 = vmatpush2.bf16.msra.mxu1 %v3080_v6  ;;  %1667 = vmatprep.subr.bf16.mxu0 %v3081_v7  ;;  %v3158_v6 = vld [vmem:[%s4639_s1 + $0x7a0] ss:$16 sps:$4 sm:$0xff]   ;;  %v3163_v7 = vld [vmem:[%s4639_s1 + $0x584] ss:$16 sps:$4 sm:$0xff]  }
  0x39   :  { %1708 = vmatprep.subr.bf16.mxu1 %v3083_v8  ;;  %v3166_v8 = vld [vmem:[%s4639_s1 + $0x784] ss:$16 sps:$4 sm:$0xff]   ;;  %v3176_v20 = vld [vmem:[%s4639_s1 + $0x740] ss:$16 sps:$4 sm:$0xff]  }
  0x3a   :  { %v3181_v21 = vld [vmem:[%s4639_s1 + $0x524] ss:$16 sps:$4 sm:$0xff]  }
  0x3b   :  { %1668 = vmatpush2.bf16.msra.mxu0 %v3085_v10  ;;  %v3164_v10 = vld [vmem:[%s4639_s1 + $0x780] ss:$16 sps:$4 sm:$0xff]  }
  0x3c   :  { %1709 = vmatpush2.bf16.msra.mxu1 %v3086_v11  ;;  %1669 = vmatprep.subr.bf16.mxu0 %v3087_v12  ;;  %v3169_v11 = vld [vmem:[%s4639_s1 + $0x564] ss:$16 sps:$4 sm:$0xff]  }
  0x3d   :  { %1710 = vmatprep.subr.bf16.mxu1 %v3089_v13  ;;  %v3172_v12 = vld [vmem:[%s4639_s1 + $0x764] ss:$16 sps:$4 sm:$0xff]   ;;  %v3167_v13 = vld [vmem:[%s4639_s1 + $0x560] ss:$16 sps:$4 sm:$0xff]  }
  0x3f   :  { %1670 = vmatpush2.bf16.msra.mxu0 %v3091_v16  ;;  %v3170_v16 = vld [vmem:[%s4639_s1 + $0x760] ss:$16 sps:$4 sm:$0xff]  }
  0x40   :  { %1711 = vmatpush2.bf16.msra.mxu1 %v3092_v17  ;;  %1721 = vmatprep.subr.bf16.mxu0 %v3097_v18  ;;  %v3175_v17 = vld [vmem:[%s4639_s1 + $0x544] ss:$16 sps:$4 sm:$0xff]  }
  0x41   :  { %1762 = vmatprep.subr.bf16.mxu1 %v3100_v19  ;;  %v3178_v18 = vld [vmem:[%s4639_s1 + $0x744] ss:$16 sps:$4 sm:$0xff]   ;;  %v3173_v19 = vld [vmem:[%s4639_s1 + $0x540] ss:$16 sps:$4 sm:$0xff]  }
  0x42   :  { %1672 = vmatmul.mubr.bf16.vlgmr.msra.gmra.mxu0 %v3757_v22 }
  0x43   :  { %1713 = vmatmul.mubr.bf16.vlgmr.msra.gmra.mxu1 %v3759_v23  ;;  %1722 = vmatpush1.bf16.msra.mxu0 %v3095_v24  ;;  %v3184_v24 = vld [vmem:[%s4639_s1 + $0x724] ss:$16 sps:$4 sm:$0xff]  }
  0x44   :  { %1763 = vmatpush1.bf16.msra.mxu1 %v3098_v25  ;;  %1723 = vmatprep.subr.bf16.mxu0 %v3103_v26  ;;  %v3179_v25 = vld [vmem:[%s4639_s1 + $0x520] ss:$16 sps:$4 sm:$0xff]  }
  0x45   :  { %1764 = vmatprep.subr.bf16.mxu1 %v3106_v27  ;;  %1753 = vmatprep.mubr.bf16.mxu0 %v3773_v28  ;;  %v3182_v26 = vld [vmem:[%s4639_s1 + $0x720] ss:$16 sps:$4 sm:$0xff]   ;;  %v3187_v27 = vld [vmem:[%s4639_s1 + $0x504] ss:$16 sps:$4 sm:$0xff]  }
  0x46   :  { %1794 = vmatprep.mubr.bf16.mxu1 %v3775_v29 }
  0x47   :  { %1724 = vmatpush1.bf16.msra.mxu0 %v3101_v30  ;;  %v3190_v30 = vld [vmem:[%s4639_s1 + $0x704] ss:$16 sps:$4 sm:$0xff]  }
  0x48   :  { %1765 = vmatpush1.bf16.msra.mxu1 %v3104_v31  ;;  %1725 = vmatprep.subr.bf16.mxu0 %v3109_v32  ;;  %v3185_v31 = vld [vmem:[%s4639_s1 + $0x500] ss:$16 sps:$4 sm:$0xff]  }
  0x49   :  { %1766 = vmatprep.subr.bf16.mxu1 %v3112_v33  ;;  %v3188_v32 = vld [vmem:[%s4639_s1 + $0x700] ss:$16 sps:$4 sm:$0xff]   ;;  %v3193_v33 = vld [vmem:[%s4639_s1 + $0xec] ss:$16 sps:$4 sm:$0xff]  }
  0x4b   :  { %1726 = vmatpush1.bf16.msra.mxu0 %v3107_v34  ;;  %v3196_v34 = vld [vmem:[%s4639_s1 + $0x2ec] ss:$16 sps:$4 sm:$0xff]  }
  0x4c   :  { %1767 = vmatpush1.bf16.msra.mxu1 %v3110_v35  ;;  %1727 = vmatprep.subr.bf16.mxu0 %v3115_v36  ;;  %v3963_v35 = vpack.c.bf16 %v3737_v14, %v3737_v14  ;;  %v3967_v36 = vpack.c.bf16 %v3739_v15, %v3739_v15  ;;  %v3199_v14 = vld [vmem:[%s4639_s1 + $0xcc] ss:$16 sps:$4 sm:$0xff]  }
  0x4d   :  { %1768 = vmatprep.subr.bf16.mxu1 %v3118_v37  ;;  %v3191_v37 = vld [vmem:[%s4639_s1 + $0xe8] ss:$16 sps:$4 sm:$0xff]   ;;  %v3202_v15 = vld [vmem:[%s4639_s1 + $0x2cc] ss:$16 sps:$4 sm:$0xff]  }
  0x4f   :  { %1728 = vmatpush1.bf16.msra.mxu0 %v3113_v38  ;;  %v3194_v38 = vld [vmem:[%s4639_s1 + $0x2e8] ss:$16 sps:$4 sm:$0xff]  }
  0x50   :  { %1769 = vmatpush1.bf16.msra.mxu1 %v3116_v39  ;;  %1729 = vmatprep.subr.bf16.mxu0 %v3121_v40  ;;  %v3197_v39 = vld [vmem:[%s4639_s1 + $0xc8] ss:$16 sps:$4 sm:$0xff]  }
  0x51   :  { %1770 = vmatprep.subr.bf16.mxu1 %v3124_v41  ;;  %v3200_v40 = vld [vmem:[%s4639_s1 + $0x2c8] ss:$16 sps:$4 sm:$0xff]   ;;  %v3205_v41 = vld [vmem:[%s4639_s1 + $0xac] ss:$16 sps:$4 sm:$0xff]  }
  0x53   :  { %1730 = vmatpush1.bf16.msra.mxu0 %v3119_v42  ;;  %v3208_v42 = vld [vmem:[%s4639_s1 + $0x2ac] ss:$16 sps:$4 sm:$0xff]  }
  0x54   :  { %1771 = vmatpush1.bf16.msra.mxu1 %v3122_v44  ;;  %1731 = vmatprep.subr.bf16.mxu0 %v3127_v45  ;;  %v3203_v44 = vld [vmem:[%s4639_s1 + $0xa8] ss:$16 sps:$4 sm:$0xff]  }
  0x55   :  { %1772 = vmatprep.subr.bf16.mxu1 %v3130_v46  ;;  %v3206_v45 = vld [vmem:[%s4639_s1 + $0x2a8] ss:$16 sps:$4 sm:$0xff]   ;;  %v3211_v46 = vld [vmem:[%s4639_s1 + $0x8c] ss:$16 sps:$4 sm:$0xff]  }
  0x57   :  { %1732 = vmatpush1.bf16.msra.mxu0 %v3125_v47  ;;  %v3212_v47 = vld [vmem:[%s4639_s1 + $0x288] ss:$16 sps:$4 sm:$0xff]  }
  0x58   :  { %1773 = vmatpush1.bf16.msra.mxu1 %v3128_v48  ;;  %1733 = vmatprep.subr.bf16.mxu0 %v3133_v49  ;;  %v3217_v48 = vld [vmem:[%s4639_s1 + $0x6c] ss:$16 sps:$4 sm:$0xff]  }
  0x59   :  { %1774 = vmatprep.subr.bf16.mxu1 %v3136_v50  ;;  %v3220_v49 = vld [vmem:[%s4639_s1 + $0x26c] ss:$16 sps:$4 sm:$0xff]   ;;  %v3215_v50 = vld [vmem:[%s4639_s1 + $0x68] ss:$16 sps:$4 sm:$0xff]  }
  0x5b   :  { %1734 = vmatpush1.bf16.msra.mxu0 %v3131_v51  ;;  %v3218_v51 = vld [vmem:[%s4639_s1 + $0x268] ss:$16 sps:$4 sm:$0xff]  }
  0x5c   :  { %1775 = vmatpush1.bf16.msra.mxu1 %v3134_v52  ;;  %1735 = vmatprep.subr.bf16.mxu0 %v3139_v53  ;;  %v3223_v52 = vld [vmem:[%s4639_s1 + $0x4c] ss:$16 sps:$4 sm:$0xff]  }
  0x5d   :  { %1776 = vmatprep.subr.bf16.mxu1 %v3142_v54  ;;  %v3226_v53 = vld [vmem:[%s4639_s1 + $0x24c] ss:$16 sps:$4 sm:$0xff]   ;;  %v3221_v54 = vld [vmem:[%s4639_s1 + $0x48] ss:$16 sps:$4 sm:$0xff]  }
  0x5f   :  { %1736 = vmatpush1.bf16.msra.mxu0 %v3137_v55  ;;  %v3224_v55 = vld [vmem:[%s4639_s1 + $0x248] ss:$16 sps:$4 sm:$0xff]  }
  0x60   :  { %1777 = vmatpush1.bf16.msra.mxu1 %v3140_v56  ;;  %1737 = vmatprep.subr.bf16.mxu0 %v3145_v57  ;;  %v3229_v56 = vld [vmem:[%s4639_s1 + $0x2c] ss:$16 sps:$4 sm:$0xff]  }
  0x61   :  { %1778 = vmatprep.subr.bf16.mxu1 %v3148_v58  ;;  %v3232_v57 = vld [vmem:[%s4639_s1 + $0x22c] ss:$16 sps:$4 sm:$0xff]   ;;  %v3227_v58 = vld [vmem:[%s4639_s1 + $0x28] ss:$16 sps:$4 sm:$0xff]  }
  0x63   :  { %1738 = vmatpush2.bf16.msra.mxu0 %v3143_v59  ;;  %v3230_v59 = vld [vmem:[%s4639_s1 + $0x228] ss:$16 sps:$4 sm:$0xff]  }
  0x64   :  { %1779 = vmatpush2.bf16.msra.mxu1 %v3146_v60  ;;  %1739 = vmatprep.subr.bf16.mxu0 %v3151_v62  ;;  %v3235_v60 = vld [vmem:[%s4639_s1 + $0xc] ss:$16 sps:$4 sm:$0xff]  }
  0x65   :  { %1780 = vmatprep.subr.bf16.mxu1 %v3154_v63  ;;  %v3238_v62 = vld [vmem:[%s4639_s1 + $0x20c] ss:$16 sps:$4 sm:$0xff]   ;;  %v3233_v63 = vld [vmem:[%s4639_s1 + $0x8] ss:$16 sps:$4 sm:$0xff]  }
  0x67   :  { %1740 = vmatpush2.bf16.msra.mxu0 %v3149_v0  ;;  %v3236_v0 = vld [vmem:[%s4639_s1 + $0x208] ss:$16 sps:$4 sm:$0xff]  }
  0x68   :  { %1781 = vmatpush2.bf16.msra.mxu1 %v3152_v1  ;;  %1741 = vmatprep.subr.bf16.mxu0 %v3157_v2  ;;  %v3241_v1 = vld [vmem:[%s4639_s1 + $0x1ec] ss:$16 sps:$4 sm:$0xff]  }
  0x69   :  { %1782 = vmatprep.subr.bf16.mxu1 %v3160_v4  ;;  %v3244_v2 = vld [vmem:[%s4639_s1 + $0x3ec] ss:$16 sps:$4 sm:$0xff]   ;;  %v3239_v4 = vld [vmem:[%s4639_s1 + $0x1e8] ss:$16 sps:$4 sm:$0xff]  }
  0x6b   :  { %1742 = vmatpush2.bf16.msra.mxu0 %v3155_v5  ;;  %v3242_v5 = vld [vmem:[%s4639_s1 + $0x3e8] ss:$16 sps:$4 sm:$0xff]  }
  0x6c   :  { %1783 = vmatpush2.bf16.msra.mxu1 %v3158_v6  ;;  %1743 = vmatprep.subr.bf16.mxu0 %v3163_v7  ;;  %v3247_v6 = vld [vmem:[%s4639_s1 + $0x1cc] ss:$16 sps:$4 sm:$0xff]  }
  0x6d   :  { %1784 = vmatprep.subr.bf16.mxu1 %v3166_v8  ;;  %v3250_v7 = vld [vmem:[%s4639_s1 + $0x3cc] ss:$16 sps:$4 sm:$0xff]   ;;  %v3245_v8 = vld [vmem:[%s4639_s1 + $0x1c8] ss:$16 sps:$4 sm:$0xff]  }
  0x6f   :  { %1744 = vmatpush2.bf16.msra.mxu0 %v3161_v9  ;;  %v3248_v9 = vld [vmem:[%s4639_s1 + $0x3c8] ss:$16 sps:$4 sm:$0xff]  }
  0x70   :  { %1785 = vmatpush2.bf16.msra.mxu1 %v3164_v10  ;;  %1745 = vmatprep.subr.bf16.mxu0 %v3169_v11  ;;  %v3253_v10 = vld [vmem:[%s4639_s1 + $0x1ac] ss:$16 sps:$4 sm:$0xff]  }
  0x71   :  { %1786 = vmatprep.subr.bf16.mxu1 %v3172_v12  ;;  %v3256_v11 = vld [vmem:[%s4639_s1 + $0x3ac] ss:$16 sps:$4 sm:$0xff]   ;;  %v3251_v12 = vld [vmem:[%s4639_s1 + $0x1a8] ss:$16 sps:$4 sm:$0xff]  }
  0x73   :  { %1746 = vmatpush2.bf16.msra.mxu0 %v3167_v13  ;;  %v3254_v13 = vld [vmem:[%s4639_s1 + $0x3a8] ss:$16 sps:$4 sm:$0xff]  }
  0x74   :  { %1787 = vmatpush2.bf16.msra.mxu1 %v3170_v16  ;;  %1747 = vmatprep.subr.bf16.mxu0 %v3175_v17  ;;  %v3259_v16 = vld [vmem:[%s4639_s1 + $0x18c] ss:$16 sps:$4 sm:$0xff]  }
  0x75   :  { %1788 = vmatprep.subr.bf16.mxu1 %v3178_v18  ;;  %v3262_v17 = vld [vmem:[%s4639_s1 + $0x38c] ss:$16 sps:$4 sm:$0xff]   ;;  %v3257_v18 = vld [vmem:[%s4639_s1 + $0x188] ss:$16 sps:$4 sm:$0xff]  }
  0x77   :  { %1748 = vmatpush2.bf16.msra.mxu0 %v3173_v19  ;;  %v3260_v19 = vld [vmem:[%s4639_s1 + $0x388] ss:$16 sps:$4 sm:$0xff]  }
  0x78   :  { %1789 = vmatpush2.bf16.msra.mxu1 %v3176_v20  ;;  %1749 = vmatprep.subr.bf16.mxu0 %v3181_v21  ;;  %v3265_v20 = vld [vmem:[%s4639_s1 + $0x16c] ss:$16 sps:$4 sm:$0xff]  }
  0x79   :  { %1790 = vmatprep.subr.bf16.mxu1 %v3184_v24  ;;  %v3268_v21 = vld [vmem:[%s4639_s1 + $0x36c] ss:$16 sps:$4 sm:$0xff]   ;;  %v3263_v24 = vld [vmem:[%s4639_s1 + $0x168] ss:$16 sps:$4 sm:$0xff]  }
  0x7b   :  { %1750 = vmatpush2.bf16.msra.mxu0 %v3179_v25  ;;  %v3266_v25 = vld [vmem:[%s4639_s1 + $0x368] ss:$16 sps:$4 sm:$0xff]  }
  0x7c   :  { %1791 = vmatpush2.bf16.msra.mxu1 %v3182_v26  ;;  %1751 = vmatprep.subr.bf16.mxu0 %v3187_v27  ;;  %v3271_v26 = vld [vmem:[%s4639_s1 + $0x14c] ss:$16 sps:$4 sm:$0xff]  }
  0x7d   :  { %1792 = vmatprep.subr.bf16.mxu1 %v3190_v30  ;;  %v3274_v27 = vld [vmem:[%s4639_s1 + $0x34c] ss:$16 sps:$4 sm:$0xff]   ;;  %v3269_v30 = vld [vmem:[%s4639_s1 + $0x148] ss:$16 sps:$4 sm:$0xff]  }
  0x7f   :  { %1752 = vmatpush2.bf16.msra.mxu0 %v3185_v31  ;;  %v3272_v31 = vld [vmem:[%s4639_s1 + $0x348] ss:$16 sps:$4 sm:$0xff]  }
  0x80   :  { %1793 = vmatpush2.bf16.msra.mxu1 %v3188_v32  ;;  %1803 = vmatprep.subr.bf16.mxu0 %v3193_v33  ;;  %v3277_v32 = vld [vmem:[%s4639_s1 + $0x12c] ss:$16 sps:$4 sm:$0xff]  }
  0x81   :  { %1844 = vmatprep.subr.bf16.mxu1 %v3196_v34  ;;  %v3280_v33 = vld [vmem:[%s4639_s1 + $0x32c] ss:$16 sps:$4 sm:$0xff]   ;;  %v3275_v34 = vld [vmem:[%s4639_s1 + $0x128] ss:$16 sps:$4 sm:$0xff]  }
  0x82   :  { %1754 = vmatmul.mubr.bf16.vlgmr.msra.gmra.mxu0 %v3963_v35 }
  0x83   :  { %1795 = vmatmul.mubr.bf16.vlgmr.msra.gmra.mxu1 %v3967_v36  ;;  %1804 = vmatpush1.bf16.msra.mxu0 %v3191_v37  ;;  %v3278_v37 = vld [vmem:[%s4639_s1 + $0x328] ss:$16 sps:$4 sm:$0xff]  }
  0x84   :  { %1845 = vmatpush1.bf16.msra.mxu1 %v3194_v38  ;;  %1805 = vmatprep.subr.bf16.mxu0 %v3199_v14  ;;  %v3283_v38 = vld [vmem:[%s4639_s1 + $0x10c] ss:$16 sps:$4 sm:$0xff]  }
  0x85   :  { %1846 = vmatprep.subr.bf16.mxu1 %v3202_v15  ;;  %1835 = vmatprep.mubr.bf16.mxu0 %v3692_v61  ;;  %v3214_v61 = vld [vmem:[%s4639_s1 + $0x28c] ss:$16 sps:$4 sm:$0xff]   ;;  %v3281_v15 = vld [vmem:[%s4639_s1 + $0x108] ss:$16 sps:$4 sm:$0xff]  }
  0x86   :  { %1876 = vmatprep.mubr.bf16.mxu1 %v3706_v3  ;;  %v3209_v3 = vld [vmem:[%s4639_s1 + $0x88] ss:$16 sps:$4 sm:$0xff]   ;;  %v3286_v14 = vld [vmem:[%s4639_s1 + $0x30c] ss:$16 sps:$4 sm:$0xff]  }
  0x87   :  { %1806 = vmatpush1.bf16.msra.mxu0 %v3197_v39  ;;  %v3284_v39 = vld [vmem:[%s4639_s1 + $0x308] ss:$16 sps:$4 sm:$0xff]  }
  0x88   :  { %1847 = vmatpush1.bf16.msra.mxu1 %v3200_v40  ;;  %1807 = vmatprep.subr.bf16.mxu0 %v3205_v41  ;;  %v3289_v40 = vld [vmem:[%s4639_s1 + $0x4ec] ss:$16 sps:$4 sm:$0xff]  }
  0x89   :  { %1848 = vmatprep.subr.bf16.mxu1 %v3208_v42  ;;  %v3292_v41 = vld [vmem:[%s4639_s1 + $0x6ec] ss:$16 sps:$4 sm:$0xff]   ;;  %v3287_v42 = vld [vmem:[%s4639_s1 + $0x4e8] ss:$16 sps:$4 sm:$0xff]  }
  0x8b   :  { %1808 = vmatpush1.bf16.msra.mxu0 %v3203_v44  ;;  %v3290_v44 = vld [vmem:[%s4639_s1 + $0x6e8] ss:$16 sps:$4 sm:$0xff]  }
  0x8c   :  { %1849 = vmatpush1.bf16.msra.mxu1 %v3206_v45  ;;  %1809 = vmatprep.subr.bf16.mxu0 %v3211_v46  ;;  %v3295_v45 = vld [vmem:[%s4639_s1 + $0x4cc] ss:$16 sps:$4 sm:$0xff]  }
  0x8d   :  { %1850 = vmatprep.subr.bf16.mxu1 %v3214_v61  ;;  %v3298_v46 = vld [vmem:[%s4639_s1 + $0x6cc] ss:$16 sps:$4 sm:$0xff]   ;;  %v3293_v61 = vld [vmem:[%s4639_s1 + $0x4c8] ss:$16 sps:$4 sm:$0xff]  }
  0x8f   :  { %1810 = vmatpush1.bf16.msra.mxu0 %v3209_v3  ;;  %v3296_v3 = vld [vmem:[%s4639_s1 + $0x6c8] ss:$16 sps:$4 sm:$0xff]  }
  0x90   :  { %1851 = vmatpush1.bf16.msra.mxu1 %v3212_v47  ;;  %1811 = vmatprep.subr.bf16.mxu0 %v3217_v48  ;;  %v3301_v47 = vld [vmem:[%s4639_s1 + $0x4ac] ss:$16 sps:$4 sm:$0xff]  }
  0x91   :  { %1852 = vmatprep.subr.bf16.mxu1 %v3220_v49  ;;  %v3304_v48 = vld [vmem:[%s4639_s1 + $0x6ac] ss:$16 sps:$4 sm:$0xff]   ;;  %v3299_v49 = vld [vmem:[%s4639_s1 + $0x4a8] ss:$16 sps:$4 sm:$0xff]  }
  0x93   :  { %1812 = vmatpush1.bf16.msra.mxu0 %v3215_v50  ;;  %v3310_v50 = vld [vmem:[%s4639_s1 + $0x68c] ss:$16 sps:$4 sm:$0xff]  }
  0x94   :  { %1853 = vmatpush1.bf16.msra.mxu1 %v3218_v51  ;;  %1813 = vmatprep.subr.bf16.mxu0 %v3223_v52  ;;  %v3313_v51 = vld [vmem:[%s4639_s1 + $0x46c] ss:$16 sps:$4 sm:$0xff]  }
  0x95   :  { %1854 = vmatprep.subr.bf16.mxu1 %v3226_v53  ;;  %v3316_v52 = vld [vmem:[%s4639_s1 + $0x66c] ss:$16 sps:$4 sm:$0xff]   ;;  %v3311_v53 = vld [vmem:[%s4639_s1 + $0x468] ss:$16 sps:$4 sm:$0xff]  }
  0x97   :  { %1814 = vmatpush1.bf16.msra.mxu0 %v3221_v54  ;;  %v3314_v54 = vld [vmem:[%s4639_s1 + $0x668] ss:$16 sps:$4 sm:$0xff]  }
  0x98   :  { %1855 = vmatpush1.bf16.msra.mxu1 %v3224_v55  ;;  %1815 = vmatprep.subr.bf16.mxu0 %v3229_v56  ;;  %v3319_v55 = vld [vmem:[%s4639_s1 + $0x44c] ss:$16 sps:$4 sm:$0xff]  }
  0x99   :  { %1856 = vmatprep.subr.bf16.mxu1 %v3232_v57  ;;  %v3322_v56 = vld [vmem:[%s4639_s1 + $0x64c] ss:$16 sps:$4 sm:$0xff]   ;;  %v3317_v57 = vld [vmem:[%s4639_s1 + $0x448] ss:$16 sps:$4 sm:$0xff]  }
  0x9b   :  { %1816 = vmatpush1.bf16.msra.mxu0 %v3227_v58  ;;  %v3320_v58 = vld [vmem:[%s4639_s1 + $0x648] ss:$16 sps:$4 sm:$0xff]  }
  0x9c   :  { %1857 = vmatpush1.bf16.msra.mxu1 %v3230_v59  ;;  %1817 = vmatprep.subr.bf16.mxu0 %v3235_v60  ;;  %v3325_v59 = vld [vmem:[%s4639_s1 + $0x42c] ss:$16 sps:$4 sm:$0xff]  }
  0x9d   :  { %1858 = vmatprep.subr.bf16.mxu1 %v3238_v62  ;;  %v3328_v60 = vld [vmem:[%s4639_s1 + $0x62c] ss:$16 sps:$4 sm:$0xff]   ;;  %v3323_v62 = vld [vmem:[%s4639_s1 + $0x428] ss:$16 sps:$4 sm:$0xff]  }
  0x9f   :  { %1818 = vmatpush1.bf16.msra.mxu0 %v3233_v63  ;;  %v3326_v63 = vld [vmem:[%s4639_s1 + $0x628] ss:$16 sps:$4 sm:$0xff]  }
  0xa0   :  { %1859 = vmatpush1.bf16.msra.mxu1 %v3236_v0  ;;  %1819 = vmatprep.subr.bf16.mxu0 %v3241_v1  ;;  %v3331_v0 = vld [vmem:[%s4639_s1 + $0x40c] ss:$16 sps:$4 sm:$0xff]  }
  0xa1   :  { %1860 = vmatprep.subr.bf16.mxu1 %v3244_v2  ;;  %v3334_v1 = vld [vmem:[%s4639_s1 + $0x60c] ss:$16 sps:$4 sm:$0xff]   ;;  %v3329_v2 = vld [vmem:[%s4639_s1 + $0x408] ss:$16 sps:$4 sm:$0xff]  }
  0xa3   :  { %1820 = vmatpush2.bf16.msra.mxu0 %v3239_v4  ;;  %v3332_v4 = vld [vmem:[%s4639_s1 + $0x608] ss:$16 sps:$4 sm:$0xff]  }
  0xa4   :  { %1861 = vmatpush2.bf16.msra.mxu1 %v3242_v5  ;;  %1821 = vmatprep.subr.bf16.mxu0 %v3247_v6  ;;  %v3337_v5 = vld [vmem:[%s4639_s1 + $0x5ec] ss:$16 sps:$4 sm:$0xff]  }
  0xa5   :  { %1862 = vmatprep.subr.bf16.mxu1 %v3250_v7  ;;  %v3340_v6 = vld [vmem:[%s4639_s1 + $0x7ec] ss:$16 sps:$4 sm:$0xff]   ;;  %v3335_v7 = vld [vmem:[%s4639_s1 + $0x5e8] ss:$16 sps:$4 sm:$0xff]  }
  0xa7   :  { %1822 = vmatpush2.bf16.msra.mxu0 %v3245_v8  ;;  %v3338_v8 = vld [vmem:[%s4639_s1 + $0x7e8] ss:$16 sps:$4 sm:$0xff]  }
  0xa8   :  { %1863 = vmatpush2.bf16.msra.mxu1 %v3248_v9  ;;  %1823 = vmatprep.subr.bf16.mxu0 %v3253_v10  ;;  %v3343_v9 = vld [vmem:[%s4639_s1 + $0x5cc] ss:$16 sps:$4 sm:$0xff]  }
  0xa9   :  { %1864 = vmatprep.subr.bf16.mxu1 %v3256_v11  ;;  %v3346_v10 = vld [vmem:[%s4639_s1 + $0x7cc] ss:$16 sps:$4 sm:$0xff]   ;;  %v3341_v11 = vld [vmem:[%s4639_s1 + $0x5c8] ss:$16 sps:$4 sm:$0xff]  }
  0xab   :  { %1824 = vmatpush2.bf16.msra.mxu0 %v3251_v12  ;;  %v3344_v12 = vld [vmem:[%s4639_s1 + $0x7c8] ss:$16 sps:$4 sm:$0xff]  }
  0xac   :  { %1865 = vmatpush2.bf16.msra.mxu1 %v3254_v13  ;;  %1825 = vmatprep.subr.bf16.mxu0 %v3259_v16  ;;  %v3349_v13 = vld [vmem:[%s4639_s1 + $0x5ac] ss:$16 sps:$4 sm:$0xff]  }
  0xad   :  { %1866 = vmatprep.subr.bf16.mxu1 %v3262_v17  ;;  %v3352_v16 = vld [vmem:[%s4639_s1 + $0x7ac] ss:$16 sps:$4 sm:$0xff]   ;;  %v3347_v17 = vld [vmem:[%s4639_s1 + $0x5a8] ss:$16 sps:$4 sm:$0xff]  }
  0xaf   :  { %1826 = vmatpush2.bf16.msra.mxu0 %v3257_v18  ;;  %v3350_v18 = vld [vmem:[%s4639_s1 + $0x7a8] ss:$16 sps:$4 sm:$0xff]  }
  0xb0   :  { %1867 = vmatpush2.bf16.msra.mxu1 %v3260_v19  ;;  %1827 = vmatprep.subr.bf16.mxu0 %v3265_v20  ;;  %v3355_v19 = vld [vmem:[%s4639_s1 + $0x58c] ss:$16 sps:$4 sm:$0xff]  }
  0xb1   :  { %1868 = vmatprep.subr.bf16.mxu1 %v3268_v21  ;;  %v3358_v20 = vld [vmem:[%s4639_s1 + $0x78c] ss:$16 sps:$4 sm:$0xff]   ;;  %v3353_v21 = vld [vmem:[%s4639_s1 + $0x588] ss:$16 sps:$4 sm:$0xff]  }
  0xb3   :  { %1828 = vmatpush2.bf16.msra.mxu0 %v3263_v24  ;;  %v3356_v24 = vld [vmem:[%s4639_s1 + $0x788] ss:$16 sps:$4 sm:$0xff]  }
  0xb4   :  { %1869 = vmatpush2.bf16.msra.mxu1 %v3266_v25  ;;  %1829 = vmatprep.subr.bf16.mxu0 %v3271_v26  ;;  %v3361_v25 = vld [vmem:[%s4639_s1 + $0x56c] ss:$16 sps:$4 sm:$0xff]  }
  0xb5   :  { %1870 = vmatprep.subr.bf16.mxu1 %v3274_v27  ;;  %v3364_v26 = vld [vmem:[%s4639_s1 + $0x76c] ss:$16 sps:$4 sm:$0xff]   ;;  %v3359_v27 = vld [vmem:[%s4639_s1 + $0x568] ss:$16 sps:$4 sm:$0xff]  }
  0xb7   :  { %1830 = vmatpush2.bf16.msra.mxu0 %v3269_v30  ;;  %v3362_v30 = vld [vmem:[%s4639_s1 + $0x768] ss:$16 sps:$4 sm:$0xff]  }
  0xb8   :  { %1871 = vmatpush2.bf16.msra.mxu1 %v3272_v31  ;;  %1831 = vmatprep.subr.bf16.mxu0 %v3277_v32  ;;  %v3367_v31 = vld [vmem:[%s4639_s1 + $0x54c] ss:$16 sps:$4 sm:$0xff]  }
  0xb9   :  { %1872 = vmatprep.subr.bf16.mxu1 %v3280_v33  ;;  %v3370_v32 = vld [vmem:[%s4639_s1 + $0x74c] ss:$16 sps:$4 sm:$0xff]   ;;  %v3365_v33 = vld [vmem:[%s4639_s1 + $0x548] ss:$16 sps:$4 sm:$0xff]  }
  0xbb   :  { %1832 = vmatpush2.bf16.msra.mxu0 %v3275_v34  ;;  %v3368_v34 = vld [vmem:[%s4639_s1 + $0x748] ss:$16 sps:$4 sm:$0xff]  }
  0xbc   :  { %1873 = vmatpush2.bf16.msra.mxu1 %v3278_v37  ;;  %1833 = vmatprep.subr.bf16.mxu0 %v3283_v38  ;;  %v3373_v37 = vld [vmem:[%s4639_s1 + $0x52c] ss:$16 sps:$4 sm:$0xff]  }
  0xbd   :  { %1874 = vmatprep.subr.bf16.mxu1 %v3286_v14  ;;  %v3376_v38 = vld [vmem:[%s4639_s1 + $0x72c] ss:$16 sps:$4 sm:$0xff]   ;;  %v3371_v14 = vld [vmem:[%s4639_s1 + $0x528] ss:$16 sps:$4 sm:$0xff]  }
  0xbf   :  { %1834 = vmatpush2.bf16.msra.mxu0 %v3281_v15  ;;  %v3374_v15 = vld [vmem:[%s4639_s1 + $0x728] ss:$16 sps:$4 sm:$0xff]  }
  0xc0   :  { %1875 = vmatpush2.bf16.msra.mxu1 %v3284_v39  ;;  %1885 = vmatprep.subr.bf16.mxu0 %v3289_v40  ;;  %v3379_v39 = vld [vmem:[%s4639_s1 + $0x50c] ss:$16 sps:$4 sm:$0xff]  }
  0xc1   :  { %1926 = vmatprep.subr.bf16.mxu1 %v3292_v41  ;;  %v3382_v40 = vld [vmem:[%s4639_s1 + $0x70c] ss:$16 sps:$4 sm:$0xff]   ;;  %v3377_v41 = vld [vmem:[%s4639_s1 + $0x508] ss:$16 sps:$4 sm:$0xff]  }
  0xc2   :  { %1836 = vmatmul.mubr.bf16.vlgmr.msra.gmra.mxu0 %v3757_v22  ;;  %v3302_v22 = vld [vmem:[%s4639_s1 + $0x6a8] ss:$16 sps:$4 sm:$0xff]  }
  0xc3   :  { %1877 = vmatmul.mubr.bf16.vlgmr.msra.gmra.mxu1 %v3759_v23  ;;  %1886 = vmatpush1.bf16.msra.mxu0 %v3287_v42  ;;  %v3307_v23 = vld [vmem:[%s4639_s1 + $0x48c] ss:$16 sps:$4 sm:$0xff]   ;;  %v3380_v42 = vld [vmem:[%s4639_s1 + $0x708] ss:$16 sps:$4 sm:$0xff]  }
  0xc4   :  { %1927 = vmatpush1.bf16.msra.mxu1 %v3290_v44  ;;  %1887 = vmatprep.subr.bf16.mxu0 %v3295_v45  ;;  %v3385_v44 = vld [vmem:[%s4641_s3 + $0x74] ss:$8 sps:$4 sm:$0xff]   ;;  %v3383_v45 = vld [vmem:[%s4641_s3 + $0x70] ss:$8 sps:$4 sm:$0xff]  }
  0xc5   :  { %1928 = vmatprep.subr.bf16.mxu1 %v3298_v46  ;;  %1917 = vmatprep.mubr.bf16.mxu0 %v3773_v28  ;;  %v3305_v28 = vld [vmem:[%s4639_s1 + $0x488] ss:$16 sps:$4 sm:$0xff]   ;;  %v3388_v46 = vld [vmem:[%s4641_s3 + $0x64] ss:$8 sps:$4 sm:$0xff]  }
  0xc6   :  { %1958 = vmatprep.mubr.bf16.mxu1 %v3775_v29  ;;  %v3308_v29 = vld [vmem:[%s4639_s1 + $0x688] ss:$16 sps:$4 sm:$0xff]  }
  0xc7   :  { %1888 = vmatpush1.bf16.msra.mxu0 %v3293_v61 }
  0xc8   :  { %1929 = vmatpush1.bf16.msra.mxu1 %v3296_v3  ;;  %1889 = vmatprep.subr.bf16.mxu0 %v3301_v47  ;;  %v3386_v47 = vld [vmem:[%s4641_s3 + $0x60] ss:$8 sps:$4 sm:$0xff]  }
  0xc9   :  { %1930 = vmatprep.subr.bf16.mxu1 %v3304_v48 }
  0xcb   :  { %1890 = vmatpush1.bf16.msra.mxu0 %v3299_v49 }
  0xcc   :  { %1931 = vmatpush1.bf16.msra.mxu1 %v3302_v22  ;;  %1891 = vmatprep.subr.bf16.mxu0 %v3307_v23  ;;  %v3391_v22 = vld [vmem:[%s4641_s3 + $0x54] ss:$8 sps:$4 sm:$0xff]  }
  0xcd   :  { %1932 = vmatprep.subr.bf16.mxu1 %v3310_v50 }
  0xcf   :  { %1892 = vmatpush1.bf16.msra.mxu0 %v3305_v28 }
  0xd0   :  { %1933 = vmatpush1.bf16.msra.mxu1 %v3308_v29  ;;  %1893 = vmatprep.subr.bf16.mxu0 %v3313_v51  ;;  %v3394_v29 = vld [vmem:[%s4641_s3 + $0x44] ss:$8 sps:$4 sm:$0xff]   ;;  %v3431_v51 = vld [vmem:[%s4641_s3 + $0x170] ss:$8 sps:$4 sm:$0xff]  }
  0xd1   :  { %1934 = vmatprep.subr.bf16.mxu1 %v3316_v52  ;;  %v3433_v52 = vld [vmem:[%s4641_s3 + $0x174] ss:$8 sps:$4 sm:$0xff]  }
  0xd3   :  { %1894 = vmatpush1.bf16.msra.mxu0 %v3311_v53  ;;  %v3436_v53 = vld [vmem:[%s4641_s3 + $0x164] ss:$8 sps:$4 sm:$0xff]  }
  0xd4   :  { %1935 = vmatpush1.bf16.msra.mxu1 %v3314_v54  ;;  %1895 = vmatprep.subr.bf16.mxu0 %v3319_v55  ;;  %v3392_v54 = vld [vmem:[%s4641_s3 + $0x40] ss:$8 sps:$4 sm:$0xff]  }
  0xd5   :  { %1936 = vmatprep.subr.bf16.mxu1 %v3322_v56  ;;  %v3434_v55 = vld [vmem:[%s4641_s3 + $0x160] ss:$8 sps:$4 sm:$0xff]   ;;  %v3397_v56 = vld [vmem:[%s4641_s3 + $0x34] ss:$8 sps:$4 sm:$0xff]  }
  0xd7   :  { %1896 = vmatpush1.bf16.msra.mxu0 %v3317_v57  ;;  %v3439_v57 = vld [vmem:[%s4641_s3 + $0x154] ss:$8 sps:$4 sm:$0xff]  }
  0xd8   :  { %1937 = vmatpush1.bf16.msra.mxu1 %v3320_v58  ;;  %1897 = vmatprep.subr.bf16.mxu0 %v3325_v59  ;;  %v3395_v58 = vld [vmem:[%s4641_s3 + $0x30] ss:$8 sps:$4 sm:$0xff]  }
  0xd9   :  { %1938 = vmatprep.subr.bf16.mxu1 %v3328_v60  ;;  %v3437_v59 = vld [vmem:[%s4641_s3 + $0x150] ss:$8 sps:$4 sm:$0xff]   ;;  %v3400_v60 = vld [vmem:[%s4641_s3 + $0x24] ss:$8 sps:$4 sm:$0xff]  }
  0xdb   :  { %1898 = vmatpush1.bf16.msra.mxu0 %v3323_v62  ;;  %v3442_v62 = vld [vmem:[%s4641_s3 + $0x144] ss:$8 sps:$4 sm:$0xff]  }
  0xdc   :  { %1939 = vmatpush1.bf16.msra.mxu1 %v3326_v63  ;;  %1899 = vmatprep.subr.bf16.mxu0 %v3331_v0  ;;  %v3398_v63 = vld [vmem:[%s4641_s3 + $0x20] ss:$8 sps:$4 sm:$0xff]  }
  0xdd   :  { %1940 = vmatprep.subr.bf16.mxu1 %v3334_v1  ;;  %v3440_v0 = vld [vmem:[%s4641_s3 + $0x140] ss:$8 sps:$4 sm:$0xff]   ;;  %v3403_v1 = vld [vmem:[%s4641_s3 + $0x14] ss:$8 sps:$4 sm:$0xff]  }
  0xdf   :  { %1900 = vmatpush1.bf16.msra.mxu0 %v3329_v2  ;;  %v3445_v2 = vld [vmem:[%s4641_s3 + $0x134] ss:$8 sps:$4 sm:$0xff]  }
  0xe0   :  { %1941 = vmatpush1.bf16.msra.mxu1 %v3332_v4  ;;  %1901 = vmatprep.subr.bf16.mxu0 %v3337_v5  ;;  %v3401_v4 = vld [vmem:[%s4641_s3 + $0x10] ss:$8 sps:$4 sm:$0xff]  }
  0xe1   :  { %1942 = vmatprep.subr.bf16.mxu1 %v3340_v6  ;;  %v3443_v5 = vld [vmem:[%s4641_s3 + $0x130] ss:$8 sps:$4 sm:$0xff]   ;;  %v3406_v6 = vld [vmem:[%s4641_s3 + $0x4] ss:$8 sps:$4 sm:$0xff]  }
  0xe3   :  { %1902 = vmatpush2.bf16.msra.mxu0 %v3335_v7  ;;  %v3448_v7 = vld [vmem:[%s4641_s3 + $0x124] ss:$8 sps:$4 sm:$0xff]  }
  0xe4   :  { %1943 = vmatpush2.bf16.msra.mxu1 %v3338_v8  ;;  %1903 = vmatprep.subr.bf16.mxu0 %v3343_v9  ;;  %v3404_v8 = vld [vmem:[%s4641_s3] ss:$8 sps:$4 sm:$0xff]  }
  0xe5   :  { %1944 = vmatprep.subr.bf16.mxu1 %v3346_v10  ;;  %v3446_v9 = vld [vmem:[%s4641_s3 + $0x120] ss:$8 sps:$4 sm:$0xff]   ;;  %v3409_v10 = vld [vmem:[%s4641_s3 + $0xf4] ss:$8 sps:$4 sm:$0xff]  }
  0xe7   :  { %1904 = vmatpush2.bf16.msra.mxu0 %v3341_v11  ;;  %v3451_v11 = vld [vmem:[%s4641_s3 + $0x114] ss:$8 sps:$4 sm:$0xff]  }
  0xe8   :  { %1945 = vmatpush2.bf16.msra.mxu1 %v3344_v12  ;;  %1905 = vmatprep.subr.bf16.mxu0 %v3349_v13  ;;  %v3407_v12 = vld [vmem:[%s4641_s3 + $0xf0] ss:$8 sps:$4 sm:$0xff]  }
  0xe9   :  { %1946 = vmatprep.subr.bf16.mxu1 %v3352_v16  ;;  %v3449_v13 = vld [vmem:[%s4641_s3 + $0x110] ss:$8 sps:$4 sm:$0xff]   ;;  %v3412_v16 = vld [vmem:[%s4641_s3 + $0xe4] ss:$8 sps:$4 sm:$0xff]  }
  0xeb   :  { %1906 = vmatpush2.bf16.msra.mxu0 %v3347_v17  ;;  %v3454_v17 = vld [vmem:[%s4641_s3 + $0x104] ss:$8 sps:$4 sm:$0xff]  }
  0xec   :  { %1947 = vmatpush2.bf16.msra.mxu1 %v3350_v18  ;;  %1907 = vmatprep.subr.bf16.mxu0 %v3355_v19  ;;  %v3410_v18 = vld [vmem:[%s4641_s3 + $0xe0] ss:$8 sps:$4 sm:$0xff]  }
  0xed   :  { %1948 = vmatprep.subr.bf16.mxu1 %v3358_v20  ;;  %v3452_v19 = vld [vmem:[%s4641_s3 + $0x100] ss:$8 sps:$4 sm:$0xff]   ;;  %v3415_v20 = vld [vmem:[%s4641_s3 + $0xd4] ss:$8 sps:$4 sm:$0xff]  }
  0xef   :  { %1908 = vmatpush2.bf16.msra.mxu0 %v3353_v21  ;;  %v3457_v21 = vld [vmem:[%s4641_s3 + $0x1f4] ss:$8 sps:$4 sm:$0xff]  }
  0xf0   :  { %1949 = vmatpush2.bf16.msra.mxu1 %v3356_v24  ;;  %1909 = vmatprep.subr.bf16.mxu0 %v3361_v25  ;;  %v3413_v24 = vld [vmem:[%s4641_s3 + $0xd0] ss:$8 sps:$4 sm:$0xff]  }
  0xf1   :  { %1950 = vmatprep.subr.bf16.mxu1 %v3364_v26  ;;  %v3455_v25 = vld [vmem:[%s4641_s3 + $0x1f0] ss:$8 sps:$4 sm:$0xff]   ;;  %v3418_v26 = vld [vmem:[%s4641_s3 + $0xc4] ss:$8 sps:$4 sm:$0xff]  }
  0xf3   :  { %1910 = vmatpush2.bf16.msra.mxu0 %v3359_v27  ;;  %v3460_v27 = vld [vmem:[%s4641_s3 + $0x1e4] ss:$8 sps:$4 sm:$0xff]  }
  0xf4   :  { %1951 = vmatpush2.bf16.msra.mxu1 %v3362_v30  ;;  %1911 = vmatprep.subr.bf16.mxu0 %v3367_v31  ;;  %v3416_v30 = vld [vmem:[%s4641_s3 + $0xc0] ss:$8 sps:$4 sm:$0xff]  }
  0xf5   :  { %1952 = vmatprep.subr.bf16.mxu1 %v3370_v32  ;;  %v3458_v31 = vld [vmem:[%s4641_s3 + $0x1e0] ss:$8 sps:$4 sm:$0xff]   ;;  %v3421_v32 = vld [vmem:[%s4641_s3 + $0xb4] ss:$8 sps:$4 sm:$0xff]  }
  0xf7   :  { %1912 = vmatpush2.bf16.msra.mxu0 %v3365_v33  ;;  %v3463_v33 = vld [vmem:[%s4641_s3 + $0x1d4] ss:$8 sps:$4 sm:$0xff]  }
  0xf8   :  { %1953 = vmatpush2.bf16.msra.mxu1 %v3368_v34  ;;  %1913 = vmatprep.subr.bf16.mxu0 %v3373_v37  ;;  %v3419_v34 = vld [vmem:[%s4641_s3 + $0xb0] ss:$8 sps:$4 sm:$0xff]  }
  0xf9   :  { %1954 = vmatprep.subr.bf16.mxu1 %v3376_v38  ;;  %v3461_v37 = vld [vmem:[%s4641_s3 + $0x1d0] ss:$8 sps:$4 sm:$0xff]   ;;  %v3424_v38 = vld [vmem:[%s4641_s3 + $0xa4] ss:$8 sps:$4 sm:$0xff]  }
  0xfb   :  { %1914 = vmatpush2.bf16.msra.mxu0 %v3371_v14  ;;  %v3466_v14 = vld [vmem:[%s4641_s3 + $0x1c4] ss:$8 sps:$4 sm:$0xff]  }
  0xfc   :  { %1955 = vmatpush2.bf16.msra.mxu1 %v3374_v15  ;;  %1915 = vmatprep.subr.bf16.mxu0 %v3379_v39  ;;  %v3422_v15 = vld [vmem:[%s4641_s3 + $0xa0] ss:$8 sps:$4 sm:$0xff]  }
  0xfd   :  { %1956 = vmatprep.subr.bf16.mxu1 %v3382_v40  ;;  %v3464_v39 = vld [vmem:[%s4641_s3 + $0x1c0] ss:$8 sps:$4 sm:$0xff]   ;;  %v3427_v40 = vld [vmem:[%s4641_s3 + $0x94] ss:$8 sps:$4 sm:$0xff]  }
  0xff   :  { %1916 = vmatpush2.bf16.msra.mxu0 %v3377_v41  ;;  %v3469_v41 = vld [vmem:[%s4641_s3 + $0x1b4] ss:$8 sps:$4 sm:$0xff]  }
 0x100   :  { %1957 = vmatpush2.bf16.msra.mxu1 %v3380_v42  ;;  %2371 = vmatprep.subr.bf16.mxu0 %v3385_v44  ;;  %v341_v42 = vsub.s32 0, %v3653_v43  ;;  %v4531_v44 = vld [vmem:[%s4642_s2] sm:$0xf] }
 0x101   :  { %2412 = vmatprep.subr.bf16.mxu1 %v3433_v52  ;;  %v3470_v52 = vld [vmem:[%s4641_s3 + $0x1a0] ss:$8 sps:$4 sm:$0xff]  }
 0x102   :  { %v4364_v61 = vpop.f32.mrf.mxu0  ;;  %1918 = vmatmul.mubr.bf16.vlgmr.msra.gmra.mxu0 %v3963_v35  ;;  %v3389_v35 = vld [vmem:[%s4641_s3 + $0x50] ss:$8 sps:$4 sm:$0xff]  }
 0x103   :  { %v4366_v3 = vpop.f32.mrf.mxu1  ;;  %1959 = vmatmul.mubr.bf16.vlgmr.msra.gmra.mxu1 %v3967_v36  ;;  %2372 = vmatpush1.bf16.msra.mxu0 %v3383_v45  ;;  %v345_v45 = vsub.s32 1, %v3653_v43 }
 0x104   :  { %v4373_v48 = vpop.f32.mrf.mxu0  ;;  %2373 = vmatprep.subr.bf16.mxu0 %v3388_v46  ;;  %2413 = vmatpush1.bf16.msra.mxu1 %v3431_v51  ;;  %v3425_v46 = vld [vmem:[%s4641_s3 + $0x90] ss:$8 sps:$4 sm:$0xff]  }
 0x105   :  { %v4375_v49 = vpop.f32.mrf.mxu1  ;;  %2414 = vmatprep.subr.bf16.mxu1 %v3436_v53 }
 0x106   :  { %v1677_v23 = vpop.f32.mrf.mxu0 }
 0x107   :  { %v1718_v50 = vpop.f32.mrf.mxu1  ;;  %2374 = vmatpush1.bf16.msra.mxu0 %v3386_v47  ;;  %v3467_v47 = vld [vmem:[%s4641_s3 + $0x1b0] ss:$8 sps:$4 sm:$0xff]   ;;  %v342_v23 = vrot.slane %v4531_v44, %v341_v42 }
 0x108   :  { %v1678_v36 = vpop.f32.mrf.mxu0  ;;  %2375 = vmatprep.subr.bf16.mxu0 %v3391_v22  ;;  %2415 = vmatpush1.bf16.msra.mxu1 %v3434_v55  ;;  %v3430_v22 = vld [vmem:[%s4641_s3 + $0x84] ss:$8 sps:$4 sm:$0xff]   ;;  %v346_v50 = vrot.slane %v4531_v44, %v345_v45 }
 0x109   :  { %v1719_v28 = vpop.f32.mrf.mxu1  ;;  %2416 = vmatprep.subr.bf16.mxu1 %v3439_v57  ;;  %v1674_v36 = vadd.f32 %v4364_v61, %v342_v23  ;;  %v3475_v57 = vld [vmem:[%s4641_s3 + $0x194] ss:$8 sps:$4 sm:$0xff]  }
 0x10a   :  { %v1676_v28 = vadd.f32 %v4373_v48, %v346_v50 }
 0x10b   :  { %2376 = vmatpush1.bf16.msra.mxu0 %v3389_v35  ;;  %v3428_v35 = vld [vmem:[%s4641_s3 + $0x80] ss:$8 sps:$4 sm:$0xff]   ;;  %v1715_v51 = vadd.f32 %v4366_v3, %v1674_v36  ;;  %v3473_v3 = vld [vmem:[%s4641_s3 + $0x190] ss:$8 sps:$4 sm:$0xff]  }
 0x10c   :  { %2377 = vmatprep.subr.bf16.mxu0 %v3394_v29  ;;  %2417 = vmatpush1.bf16.msra.mxu1 %v3437_v59  ;;  %v3472_v29 = vld [vmem:[%s4641_s3 + $0x1a4] ss:$8 sps:$4 sm:$0xff]   ;;  %v1717_v55 = vadd.f32 %v4375_v49, %v1676_v28 }
 0x10d   :  { %2418 = vmatprep.subr.bf16.mxu1 %v3442_v62 }
 0x10f   :  { %2378 = vmatpush1.bf16.msra.mxu0 %v3392_v54 }
 0x110   :  { %2379 = vmatprep.subr.bf16.mxu0 %v3397_v56  ;;  %2419 = vmatpush1.bf16.msra.mxu1 %v3440_v0 }
 0x111   :  { %2420 = vmatprep.subr.bf16.mxu1 %v3445_v2  ;;  %v3478_v2 = vld [vmem:[%s4641_s3 + $0x184] ss:$8 sps:$4 sm:$0xff]  }
 0x113   :  { %2380 = vmatpush1.bf16.msra.mxu0 %v3395_v58 }
 0x114   :  { %2381 = vmatprep.subr.bf16.mxu0 %v3400_v60  ;;  %2421 = vmatpush1.bf16.msra.mxu1 %v3443_v5  ;;  %v3476_v5 = vld [vmem:[%s4641_s3 + $0x180] ss:$8 sps:$4 sm:$0xff]  }
 0x115   :  { %2422 = vmatprep.subr.bf16.mxu1 %v3448_v7 }
 0x117   :  { %2382 = vmatpush1.bf16.msra.mxu0 %v3398_v63 }
 0x118   :  { %2383 = vmatprep.subr.bf16.mxu0 %v3403_v1  ;;  %2423 = vmatpush1.bf16.msra.mxu1 %v3446_v9 }
 0x119   :  { %2424 = vmatprep.subr.bf16.mxu1 %v3451_v11 }
 0x11b   :  { %2384 = vmatpush1.bf16.msra.mxu0 %v3401_v4 }
 0x11c   :  { %2385 = vmatprep.subr.bf16.mxu0 %v3406_v6  ;;  %2425 = vmatpush1.bf16.msra.mxu1 %v3449_v13 }
 0x11d   :  { %2426 = vmatprep.subr.bf16.mxu1 %v3454_v17 }
 0x11f   :  { %2386 = vmatpush1.bf16.msra.mxu0 %v3404_v8 }
 0x120   :  { %2387 = vmatprep.subr.bf16.mxu0 %v3409_v10  ;;  %2427 = vmatpush1.bf16.msra.mxu1 %v3452_v19  ;;  %v3480_v19 = vld [vmem:[%s4643_s5 + $0x38] sm:$0xff]  }
 0x121   :  { %2428 = vmatprep.subr.bf16.mxu1 %v3457_v21  ;;  %v3482_v21 = vld [vmem:[%s4643_s5 + $0x30] sm:$0xff]  }
 0x123   :  { %2388 = vmatpush2.bf16.msra.mxu0 %v3407_v12 }
 0x124   :  { %2389 = vmatprep.subr.bf16.mxu0 %v3412_v16  ;;  %2429 = vmatpush2.bf16.msra.mxu1 %v3455_v25  ;;  %v3484_v25 = vld [vmem:[%s4643_s5 + $0x28] sm:$0xff]  }
 0x125   :  { %2430 = vmatprep.subr.bf16.mxu1 %v3460_v27  ;;  %v3486_v27 = vld [vmem:[%s4643_s5 + $0x20] sm:$0xff]  }
 0x127   :  { %2390 = vmatpush2.bf16.msra.mxu0 %v3410_v18  ;;  %v3479_v18 = vld [vmem:[%s4643_s5 + $0x78] sm:$0xff]  }
 0x128   :  { %2391 = vmatprep.subr.bf16.mxu0 %v3415_v20  ;;  %2431 = vmatpush2.bf16.msra.mxu1 %v3458_v31  ;;  %v3481_v20 = vld [vmem:[%s4643_s5 + $0x70] sm:$0xff]   ;;  %v3488_v31 = vld [vmem:[%s4643_s5 + $0x18] sm:$0xff]  }
 0x129   :  { %2432 = vmatprep.subr.bf16.mxu1 %v3463_v33  ;;  %v3490_v33 = vld [vmem:[%s4643_s5 + $0x10] sm:$0xff]  }
 0x12b   :  { %2392 = vmatpush2.bf16.msra.mxu0 %v3413_v24  ;;  %v3483_v24 = vld [vmem:[%s4643_s5 + $0x68] sm:$0xff]  }
 0x12c   :  { %2393 = vmatprep.subr.bf16.mxu0 %v3418_v26  ;;  %2433 = vmatpush2.bf16.msra.mxu1 %v3461_v37  ;;  %v3485_v26 = vld [vmem:[%s4643_s5 + $0x60] sm:$0xff]   ;;  %v353_v37 = vsub.s32 3, %v3653_v43 }
 0x12d   :  { %2434 = vmatprep.subr.bf16.mxu1 %v3466_v14 }
 0x12e   :  { %v354_v14 = vrot.slane %v4531_v44, %v353_v37 }
 0x12f   :  { %2394 = vmatpush2.bf16.msra.mxu0 %v3416_v30  ;;  %v3487_v30 = vld [vmem:[%s4643_s5 + $0x58] sm:$0xff]  }
 0x130   :  { %2395 = vmatprep.subr.bf16.mxu0 %v3421_v32  ;;  %2435 = vmatpush2.bf16.msra.mxu1 %v3464_v39  ;;  %v3489_v32 = vld [vmem:[%s4643_s5 + $0x50] sm:$0xff]  }
 0x131   :  { %2436 = vmatprep.subr.bf16.mxu1 %v3469_v41 }
 0x133   :  { %2396 = vmatpush2.bf16.msra.mxu0 %v3419_v34  ;;  %v349_v34 = vsub.s32 2, %v3653_v43  ;;  %v2957_v43 = vld [vmem:[%s4645_s6] ss:$0 sm:$0xff] }
 0x134   :  { %2397 = vmatprep.subr.bf16.mxu0 %v3424_v38  ;;  %2437 = vmatpush2.bf16.msra.mxu1 %v3467_v47 }
 0x135   :  { %2438 = vmatprep.subr.bf16.mxu1 %v3472_v29  ;;  %v350_v38 = vrot.slane %v4531_v44, %v349_v34 }
 0x137   :  { %2398 = vmatpush2.bf16.msra.mxu0 %v3422_v15 }
 0x138   :  { %2399 = vmatprep.subr.bf16.mxu0 %v3427_v40  ;;  %2439 = vmatpush2.bf16.msra.mxu1 %v3470_v52 }
 0x139   :  { %2440 = vmatprep.subr.bf16.mxu1 %v3475_v57  ;;  %v3492_v57 = vld [vmem:[%s4643_s5 + $0x8] sm:$0xff]  }
 0x13b   :  { %2400 = vmatpush2.bf16.msra.mxu0 %v3425_v46 }
 0x13c   :  { %2401 = vmatprep.subr.bf16.mxu0 %v3430_v22  ;;  %2441 = vmatpush2.bf16.msra.mxu1 %v3473_v3  ;;  %v3493_v3 = vld [vmem:[%s4643_s5 + $0x40] sm:$0xff]  }
 0x13d   :  { %2442 = vmatprep.subr.bf16.mxu1 %v3478_v2 }
 0x13f   :  { %2402 = vmatpush2.bf16.msra.mxu0 %v3428_v35 }
 0x140   :  { %2443 = vmatpush2.bf16.msra.mxu1 %v3476_v5  ;;  %2974 = vmatprep.subr.bf16.mxu0 %v3479_v18 }
 0x142   :  { %v1755_v53 = vpop.f32.mrf.mxu0 }
 0x143   :  { %v1796_v54 = vpop.f32.mrf.mxu1  ;;  %v1756_v56 = vadd.f32 %v1755_v53, %v1715_v51 }
 0x144   :  { %v1757_v61 = vpop.f32.mrf.mxu0 }
 0x145   :  { %v1798_v48 = vpop.f32.mrf.mxu1  ;;  %v1797_v58 = vadd.f32 %v1796_v54, %v1756_v56  ;;  %v1758_v59 = vadd.f32 %v1757_v61, %v1717_v55 }
 0x146   :  { %v1759_v60 = vpop.f32.mrf.mxu0 }
 0x147   :  { %v1800_v62 = vpop.f32.mrf.mxu1  ;;  %v1799_v63 = vadd.f32 %v1798_v48, %v1758_v59  ;;  %v1967_v49 = vmax.f32 %v1797_v58, 0.0  ;;  %v3491_v48 = vld [vmem:[%s4643_s5 + $0x48] sm:$0xff]   ;;  %v3494_v60 = vld [vmem:[%s4643_s5] sm:$0xff]  }
 0x148   :  { %v1760_v0 = vpop.f32.mrf.mxu0 }
 0x149   :  { %v1801_v1 = vpop.f32.mrf.mxu1  ;;  %v1968_v4 = vmax.f32 %v1799_v63, 0.0  ;;  %v1971_v7 = vpack.c.bf16 %v1967_v49, %v1967_v49  ;;  %v2039_v63 = vld [vmem:[%s4644_s4] sm:$0x3] }
 0x14a   :  { %v2044_v49 = vrot.slane %v2039_v63, %v341_v42  ;;  %v2048_v0 = vrot.slane %v2039_v63, %v345_v45 }
 0x14b   :  { %v1972_v6 = vpack.c.bf16 %v1968_v4, %v1968_v4 }
 0x14d   :  { %2403 = vmatprep.mubr.bf16.mxu0 %v1972_v6 }
 0x14e   :  { %2404 = vmatmul.mubr.bf16.vlgmr.msra.gmra.mxu0 %v1971_v7 }
 0x14f   :  { %2975 = vmatpush3.bf16.msra.mxu0 %v3480_v19 }
 0x150   :  { %2976 = vmatprep.subr.bf16.mxu0 %v3481_v20 }
 0x153   :  { %2977 = vmatpush3.bf16.msra.mxu0 %v3482_v21 }
 0x154   :  { %2978 = vmatprep.subr.bf16.mxu0 %v3483_v24 }
 0x157   :  { %2979 = vmatpush3.bf16.msra.mxu0 %v3484_v25 }
 0x158   :  { %2980 = vmatprep.subr.bf16.mxu0 %v3485_v26 }
 0x15b   :  { %2981 = vmatpush3.bf16.msra.mxu0 %v3486_v27 }
 0x15c   :  { %2982 = vmatprep.subr.bf16.mxu0 %v3487_v30 }
 0x15f   :  { %2983 = vmatpush3.bf16.msra.mxu0 %v3488_v31 }
 0x160   :  { %2984 = vmatprep.subr.bf16.mxu0 %v3489_v32 }
 0x163   :  { %2985 = vmatpush3.bf16.msra.mxu0 %v3490_v33 }
 0x164   :  { %2986 = vmatprep.subr.bf16.mxu0 %v3491_v48 }
 0x167   :  { %2987 = vmatpush3.bf16.msra.mxu0 %v3492_v57 }
 0x168   :  { %2988 = vmatprep.subr.bf16.mxu0 %v3493_v3 }
 0x16b   :  { %2989 = vmatpush3.bf16.msra.mxu0 %v3494_v60 }
 0x182   :  { %v1837_v8 = vpop.f32.mrf.mxu0 }
 0x183   :  { %v1878_v9 = vpop.f32.mrf.mxu1  ;;  %v1838_v15 = vadd.f32 %v1837_v8, %v350_v38 }
 0x184   :  { %v1839_v10 = vpop.f32.mrf.mxu0 }
 0x185   :  { %v1880_v11 = vpop.f32.mrf.mxu1  ;;  %v1840_v39 = vadd.f32 %v1839_v10, %v354_v14  ;;  %v1879_v40 = vadd.f32 %v1878_v9, %v1838_v15 }
 0x186   :  { %v1841_v12 = vpop.f32.mrf.mxu0 }
 0x187   :  { %v1882_v13 = vpop.f32.mrf.mxu1  ;;  %v1881_v47 = vadd.f32 %v1880_v11, %v1840_v39 }
 0x188   :  { %v1842_v16 = vpop.f32.mrf.mxu0 }
 0x189   :  { %v1883_v17 = vpop.f32.mrf.mxu1 }
 0x1c2   :  { %v1919_v41 = vpop.f32.mrf.mxu0 }
 0x1c3   :  { %v1960_v46 = vpop.f32.mrf.mxu1  ;;  %v1920_v22 = vadd.f32 %v1919_v41, %v1879_v40 }
 0x1c4   :  { %v1921_v23 = vpop.f32.mrf.mxu0 }
 0x1c5   :  { %v1962_v50 = vpop.f32.mrf.mxu1  ;;  %v1961_v35 = vadd.f32 %v1960_v46, %v1920_v22  ;;  %v1922_v36 = vadd.f32 %v1921_v23, %v1881_v47 }
 0x1c6   :  { %v1923_v28 = vpop.f32.mrf.mxu0 }
 0x1c7   :  { %v1964_v29 = vpop.f32.mrf.mxu1  ;;  %v1963_v51 = vadd.f32 %v1962_v50, %v1922_v36  ;;  %v1969_v52 = vmax.f32 %v1961_v35, 0.0 }
 0x1c8   :  { %v1924_v53 = vpop.f32.mrf.mxu0 }
 0x1c9   :  { %v1965_v54 = vpop.f32.mrf.mxu1  ;;  %v1970_v55 = vmax.f32 %v1963_v51, 0.0  ;;  %v1973_v44 = vpack.c.bf16 %v1969_v52, %v1969_v52 }
 0x1cb   :  { %v1974_v56 = vpack.c.bf16 %v1970_v55, %v1970_v55 }
 0x1cd   :  { %2444 = vmatprep.mubr.bf16.mxu1 %v1974_v56 }
 0x1ce   :  { %2445 = vmatmul.mubr.bf16.vlgmr.msra.gmra.mxu1 %v1973_v44 }
 0x20e   :  { %v2405_v61 = vpop.f32.mrf.mxu0 }
 0x20f   :  { %v2406_v1 = vadd.f32 %v2405_v61, %v2044_v49 }
 0x210   :  { %v2407_v58 = vpop.f32.mrf.mxu0 }
 0x211   :  { %v2408_v4 = vadd.f32 %v2407_v58, %v2048_v0 }
 0x212   :  { %v2409_v59 = vpop.f32.mrf.mxu0 }
 0x214   :  { %v2410_v62 = vpop.f32.mrf.mxu0 }
 0x28e   :  { %v2446_v2 = vpop.f32.mrf.mxu1 }
 0x28f   :  { %v2447_v5 = vadd.f32 %v2446_v2, %v2406_v1 }
 0x290   :  { %v2448_v6 = vpop.f32.mrf.mxu1 }
 0x291   :  { %v2449_v7 = vadd.f32 %v2448_v6, %v2408_v4  ;;  %v2453_v8 = vmax.f32 %v2447_v5, 0.0 }
 0x292   :  { %v2450_v9 = vpop.f32.mrf.mxu1 }
 0x293   :  { %v2454_v10 = vmax.f32 %v2449_v7, 0.0  ;;  %v2455_v13 = vpack.c.bf16 %v2453_v8, %v2453_v8 }
 0x294   :  { %v2451_v11 = vpop.f32.mrf.mxu1 }
 0x295   :  { %v2456_v12 = vpack.c.bf16 %v2454_v10, %v2454_v10 }
 0x297   :  { %2624 = vmatprep.mubr.bf16.mxu0 %v2456_v12 }
 0x298   :  { %2625 = vmatmul.mubr.bf16.vlgmr.msra.gmra.mxu0 %v2455_v13 }
 0x358   :  { %v2990_v16 = vpop.f32.mrf.mxu0 }
 0x35a   :  { %v2991_v42 = vpop.f32.mrf.mxu0 }
 0x35b   :  { %v2992_v45 = vadd.f32 %v2991_v42, %v2990_v16 }
 0x35c   :  { %v2993_v17 = vpop.f32.mrf.mxu0 }
 0x35d   :  { %v2627_v18 = vadd.f32 %v2992_v45, %v2957_v43 }
 0x35e   :  { %v2994_v19 = vpop.f32.mrf.mxu0 }
 0x35f   :  { %2632 = vst [vmem:[%s4646_s7] sm:$0x3] %v2627_v18 }

</bundles_post_ra>
